<compile_context>
chip_gen: v6e
topology: v6e:2x2x1
jax: 0.10.0
libtpu: 0.0.40
codegen_flags: <defaults>
</compile_context>

<pallas_src>
import functools

import jax
import jax.numpy as jnp
from jax import lax
from jax.experimental import pallas as pl
from jax.experimental.pallas import tpu as pltpu


def _lstm_heads_kernel(x_ref, wih_ref, whh_ref, b_ref, whead_ref, bhead_ref,
                       out_ref, pre_ref, *, hidden, seq_len, batch):
    """LSTM recurrence over time + fused output heads on the last hidden state.

    x_ref    : (T*B, D)    f32 time-major inputs (flattened over time, batch)
    wih_ref  : (D, 4H)     bf16, gate order (i, f, o, g)
    whh_ref  : (H, 4H)     bf16, gate order (i, f, o, g)
    b_ref    : (1, 4H)     f32  = b_ih + b_hh (reordered)
    whead_ref: (H, OUT_PAD) bf16 = [note_out.W^T | dur_out.W^T | zero pad]
    bhead_ref: (1, OUT_PAD) f32
    out_ref  : (B, OUT_PAD) f32  lane-dense fused logits
    pre_ref  : (T*B, 4H)   f32  VMEM scratch for hoisted input projection
    """
    H, T, B = hidden, seq_len, batch

    # Hoisted input projection: one big MXU matmul + bias for all timesteps,
    # removed from the serial critical path of the recurrence.
    pre_ref[...] = (
        jnp.dot(x_ref[...].astype(jnp.bfloat16), wih_ref[...],
                preferred_element_type=jnp.float32)
        + b_ref[...])

    whh = whh_ref[...]

    def step(t, carry):
        h, c = carry
        base = pl.multiple_of(t * B, B)
        gates = pre_ref[pl.ds(base, B), :] + jnp.dot(
            h.astype(jnp.bfloat16), whh, preferred_element_type=jnp.float32)
        # Gate order (i, f, o, g): one sigmoid launch over 3H lanes, one tanh.
        sig = jax.nn.sigmoid(gates[:, :3 * H])
        g = jnp.tanh(gates[:, 3 * H:])
        i = sig[:, 0 * H:1 * H]
        f = sig[:, 1 * H:2 * H]
        o = sig[:, 2 * H:3 * H]
        c_new = f * c + i * g
        h_new = o * jnp.tanh(c_new)
        return (h_new, c_new)

    h0 = jnp.zeros((B, H), jnp.float32)
    c0 = jnp.zeros((B, H), jnp.float32)
    h_last, _ = lax.fori_loop(0, T, step, (h0, c0), unroll=True)

    # Fused note/dur heads: single MXU dot, lane-dense (B, OUT_PAD) store.
    out_ref[...] = (
        jnp.dot(h_last.astype(jnp.bfloat16), whead_ref[...],
                preferred_element_type=jnp.float32)
        + bhead_ref[...])


def init_params(key, note_vocab, dur_vocab, embed_dim, hidden, num_parts):
    """PyTorch-shaped parameters (gate order i, f, g, o)."""
    ks = jax.random.split(key, 10)
    input_dim = embed_dim * 2 * num_parts
    s = 1.0 / float(hidden) ** 0.5
    u = lambda k, shape: jax.random.uniform(k, shape, jnp.float32, -s, s)
    return dict(
        note_embed=jax.random.normal(ks[0], (note_vocab, embed_dim), jnp.float32) * 0.1,
        dur_embed=jax.random.normal(ks[1], (dur_vocab, embed_dim), jnp.float32) * 0.1,
        w_ih=u(ks[2], (4 * hidden, input_dim)),
        w_hh=u(ks[3], (4 * hidden, hidden)),
        b_ih=u(ks[4], (4 * hidden,)),
        b_hh=u(ks[5], (4 * hidden,)),
        w_note=u(ks[6], (note_vocab * num_parts, hidden)),
        b_note=u(ks[7], (note_vocab * num_parts,)),
        w_dur=u(ks[8], (dur_vocab * num_parts, hidden)),
        b_dur=u(ks[9], (dur_vocab * num_parts,)),
    )


def prepare_kernel_params(params, *, hidden):
    """One-time (not per-forward) weight prep: transpose, gate-reorder,
    head-fuse, lane-pad, bf16 cast."""
    H = hidden

    def reorder(w):  # PyTorch gate blocks (i, f, g, o) -> (i, f, o, g)
        return jnp.concatenate(
            [w[0:H], w[1 * H:2 * H], w[3 * H:4 * H], w[2 * H:3 * H]], axis=0)

    wih_t = reorder(params["w_ih"]).T.astype(jnp.bfloat16)      # (D, 4H)
    whh_t = reorder(params["w_hh"]).T.astype(jnp.bfloat16)      # (H, 4H)
    b = reorder(params["b_ih"] + params["b_hh"]).reshape(1, -1).astype(jnp.float32)

    wn_t = params["w_note"].T                                    # (H, P*NV)
    wd_t = params["w_dur"].T                                     # (H, P*DV)
    whead = jnp.concatenate([wn_t, wd_t], axis=1)                # (H, P*NV+P*DV)
    bhead = jnp.concatenate([params["b_note"], params["b_dur"]])
    out_dim = whead.shape[1]
    out_pad = ((out_dim + 127) // 128) * 128                     # lane-dense
    whead = jnp.pad(whead, ((0, 0), (0, out_pad - out_dim))).astype(jnp.bfloat16)
    bhead = jnp.pad(bhead, (0, out_pad - out_dim)).reshape(1, -1).astype(jnp.float32)

    return dict(
        note_embed=params["note_embed"],
        dur_embed=params["dur_embed"],
        wih_t=wih_t, whh_t=whh_t, b=b, whead=whead, bhead=bhead)


def multi_part_generator_forward(kparams, notes_in, durs_in,
                                 *, num_parts, note_vocab, dur_vocab, hidden):
    # JAX-side glue: gather embeddings directly in TIME-MAJOR layout (only the
    # small int32 index tensors are transposed; the f32 activations never are).
    notes_tm = jnp.transpose(notes_in, (1, 0, 2))    # (T, B, P)
    durs_tm = jnp.transpose(durs_in, (1, 0, 2))
    emb_notes = kparams["note_embed"][notes_tm]      # (T, B, P, E)
    emb_durs = kparams["dur_embed"][durs_tm]         # (T, B, P, E)
    combined = jnp.concatenate([emb_notes, emb_durs], axis=-1)   # (T, B, P, 2E)
    T, B = combined.shape[0], combined.shape[1]
    x = combined.reshape(T, B, -1).astype(jnp.float32)           # (T, B, D)

    # Pad batch to a full sublane group (8) so VPU/EUP ops run unmasked.
    b_pad = max(8, ((B + 7) // 8) * 8)
    if b_pad != B:
        x = jnp.pad(x, ((0, 0), (0, b_pad - B), (0, 0)))
    D = x.shape[-1]
    x_flat = x.reshape(T * b_pad, D)

    out_pad = kparams["whead"].shape[1]
    kernel = functools.partial(_lstm_heads_kernel,
                               hidden=hidden, seq_len=T, batch=b_pad)
    vmem = pl.BlockSpec(memory_space=pltpu.MemorySpace.VMEM)

    # Whole working set (< 1 MiB) fits VMEM on v5e/v6e/v7x -> single block,
    # no grid, no explicit vmem_limit_bytes needed at these sizes.
    out = pl.pallas_call(
        kernel,
        out_shape=jax.ShapeDtypeStruct((b_pad, out_pad), jnp.float32),
        in_specs=[vmem] * 6,
        out_specs=vmem,
        scratch_shapes=[pltpu.VMEM((T * b_pad, 4 * hidden), jnp.float32)],
    )(x_flat, kparams["wih_t"], kparams["whh_t"], kparams["b"],
      kparams["whead"], kparams["bhead"])

    nv = num_parts * note_vocab
    dv = num_parts * dur_vocab
    note_logits = out[:B, :nv].reshape(B, num_parts, note_vocab)
    dur_logits = out[:B, nv:nv + dv].reshape(B, num_parts, dur_vocab)
    return note_logits, dur_logits


def reference_forward(params, notes_in, durs_in,
                      *, num_parts, note_vocab, dur_vocab, hidden):
    """Pure-JAX f32 reference matching the PyTorch forward semantics."""
    emb_notes = params["note_embed"][notes_in]
    emb_durs = params["dur_embed"][durs_in]
    combined = jnp.concatenate([emb_notes, emb_durs], axis=-1)
    B, T = combined.shape[0], combined.shape[1]
    x = combined.reshape(B, T, -1)

    W_ih, W_hh = params["w_ih"], params["w_hh"]
    b = params["b_ih"] + params["b_hh"]
    H = hidden

    def step(carry, x_t):
        h, c = carry
        gates = x_t @ W_ih.T + h @ W_hh.T + b
        i = jax.nn.sigmoid(gates[:, 0 * H:1 * H])
        f = jax.nn.sigmoid(gates[:, 1 * H:2 * H])
        g = jnp.tanh(gates[:, 2 * H:3 * H])
        o = jax.nn.sigmoid(gates[:, 3 * H:4 * H])
        c = f * c + i * g
        h = o * jnp.tanh(c)
        return (h, c), None

    h0 = jnp.zeros((B, H), jnp.float32)
    c0 = jnp.zeros((B, H), jnp.float32)
    (h_last, _), _ = lax.scan(step, (h0, c0), jnp.transpose(x, (1, 0, 2)))

    note = (h_last @ params["w_note"].T + params["b_note"]).reshape(B, num_parts, note_vocab)
    dur = (h_last @ params["w_dur"].T + params["b_dur"]).reshape(B, num_parts, dur_vocab)
    return note, dur


if __name__ == "__main__":
    NOTE_VOCAB = 16
    DUR_VOCAB = 8
    EMBED_DIM = 32
    LSTM_HIDDEN = 128
    NUM_PARTS = 4
    B, T = 2, 8

    key = jax.random.PRNGKey(0)
    k_params, k_notes, k_durs = jax.random.split(key, 3)

    params = init_params(k_params, NOTE_VOCAB, DUR_VOCAB, EMBED_DIM,
                         LSTM_HIDDEN, NUM_PARTS)
    # Weight transposes / reorders / fusion done ONCE, outside the forward path.
    kparams = prepare_kernel_params(params, hidden=LSTM_HIDDEN)

    notes_in = jax.random.randint(k_notes, (B, T, NUM_PARTS), 0, NOTE_VOCAB,
                                  dtype=jnp.int32)
    durs_in = jax.random.randint(k_durs, (B, T, NUM_PARTS), 0, DUR_VOCAB,
                                 dtype=jnp.int32)

    note_logits, dur_logits = multi_part_generator_forward(
        kparams, notes_in, durs_in,
        num_parts=NUM_PARTS, note_vocab=NOTE_VOCAB, dur_vocab=DUR_VOCAB,
        hidden=LSTM_HIDDEN)
    jax.block_until_ready((note_logits, dur_logits))

    ref_note, ref_dur = reference_forward(
        params, notes_in, durs_in,
        num_parts=NUM_PARTS, note_vocab=NOTE_VOCAB, dur_vocab=DUR_VOCAB,
        hidden=LSTM_HIDDEN)

    assert note_logits.shape == (B, NUM_PARTS, NOTE_VOCAB)
    assert dur_logits.shape == (B, NUM_PARTS, DUR_VOCAB)
    # Tolerance loosened vs the all-f32 version because LSTM/head weights run
    # through the bf16 MXU path (f32 accumulation).
    assert jnp.allclose(note_logits, ref_note, rtol=2e-2, atol=2e-2)
    assert jnp.allclose(dur_logits, ref_dur, rtol=2e-2, atol=2e-2)

    print("KERNEL_OK")
</pallas_src>

<mosaic_0001>
module attributes {stable_mosaic.version = 11 : i64} {
  func.func @_lstm_heads_kernel(%arg0: memref<64x256xf32, #tpu.memory_space<vmem>>, %arg1: memref<256x512xbf16, #tpu.memory_space<vmem>>, %arg2: memref<128x512xbf16, #tpu.memory_space<vmem>>, %arg3: memref<1x512xf32, #tpu.memory_space<vmem>>, %arg4: memref<128x128xbf16, #tpu.memory_space<vmem>>, %arg5: memref<1x128xf32, #tpu.memory_space<vmem>>, %arg6: memref<8x128xf32, #tpu.memory_space<vmem>>, %arg7: memref<64x512xf32, #tpu.memory_space<vmem>>) attributes {dimension_semantics = [], scalar_prefetch = 0 : i64, scratch_operands = 1 : i64, tpu.core_type = #tpu.core_type<tc>} {
    %c0 = arith.constant 0 : index
    %c0_0 = arith.constant 0 : index
    %0 = vector.load %arg0[%c0, %c0_0] : memref<64x256xf32, #tpu.memory_space<vmem>>, vector<64x256xf32>
    %1 = arith.truncf %0 : vector<64x256xf32> to vector<64x256xbf16>
    %c0_1 = arith.constant 0 : index
    %c0_2 = arith.constant 0 : index
    %2 = vector.load %arg1[%c0_1, %c0_2] : memref<256x512xbf16, #tpu.memory_space<vmem>>, vector<256x512xbf16>
    %cst = arith.constant dense<0.000000e+00> : vector<64x512xf32>
    %3 = tpu.matmul %1, %2, %cst {dimension_numbers = #tpu.dot_dimension_numbers<[1], [0], [0], [1], [0, 0, 1, 1], [], []>} : vector<64x256xbf16>, vector<256x512xbf16>, vector<64x512xf32> -> vector<64x512xf32>
    %c0_3 = arith.constant 0 : index
    %c0_4 = arith.constant 0 : index
    %4 = vector.load %arg3[%c0_3, %c0_4] : memref<1x512xf32, #tpu.memory_space<vmem>>, vector<1x512xf32>
    %5 = vector.broadcast %4 : vector<1x512xf32> to vector<64x512xf32>
    %6 = arith.addf %3, %5 : vector<64x512xf32>
    %c0_5 = arith.constant 0 : index
    %c0_6 = arith.constant 0 : index
    %7 = vector.load %arg7[%c0_5, %c0_6] : memref<64x512xf32, #tpu.memory_space<vmem>>, vector<64x512xf32>
    tpu.vector_store %arg7[%c0_5, %c0_6], %6 {strides = array<i32>} : memref<64x512xf32, #tpu.memory_space<vmem>>, vector<64x512xf32>,
    %c0_7 = arith.constant 0 : index
    %c0_8 = arith.constant 0 : index
    %8 = vector.load %arg2[%c0_7, %c0_8] : memref<128x512xbf16, #tpu.memory_space<vmem>>, vector<128x512xbf16>
    %cst_9 = arith.constant 0.000000e+00 : f32
    %9 = vector.broadcast %cst_9 : f32 to vector<8x128xf32>
    %cst_10 = arith.constant 0.000000e+00 : f32
    %10 = vector.broadcast %cst_10 : f32 to vector<8x128xf32>
    %c0_i32 = arith.constant 0 : i32
    %c8_i32 = arith.constant 8 : i32
    %11 = arith.muli %c0_i32, %c8_i32 : i32
    %12 = tpu.assume_multiple %11, 8 : i32
    %13 = arith.index_cast %12 : i32 to index
    %c0_11 = arith.constant 0 : index
    %14 = vector.load %arg7[%13, %c0_11] : memref<64x512xf32, #tpu.memory_space<vmem>>, vector<8x512xf32>
    %15 = arith.truncf %9 : vector<8x128xf32> to vector<8x128xbf16>
    %cst_12 = arith.constant dense<0.000000e+00> : vector<8x512xf32>
    %16 = tpu.matmul %15, %8, %cst_12 {dimension_numbers = #tpu.dot_dimension_numbers<[1], [0], [0], [1], [0, 0, 1, 1], [], []>} : vector<8x128xbf16>, vector<128x512xbf16>, vector<8x512xf32> -> vector<8x512xf32>
    %17 = arith.addf %14, %16 : vector<8x512xf32>
    %18 = vector.extract_strided_slice %17 {offsets = [0, 0], sizes = [8, 384], strides = [1, 1]} : vector<8x512xf32> to vector<8x384xf32>
    %19 = arith.negf %18 : vector<8x384xf32>
    %20 = math.exp %19 : vector<8x384xf32>
    %cst_13 = arith.constant 1.000000e+00 : f32
    %21 = vector.broadcast %cst_13 : f32 to vector<8x384xf32>
    %22 = arith.addf %21, %20 : vector<8x384xf32>
    %23 = arith.divf %21, %22 : vector<8x384xf32>
    %24 = vector.extract_strided_slice %17 {offsets = [0, 384], sizes = [8, 128], strides = [1, 1]} : vector<8x512xf32> to vector<8x128xf32>
    %25 = math.tanh %24 : vector<8x128xf32>
    %26 = vector.extract_strided_slice %23 {offsets = [0, 0], sizes = [8, 128], strides = [1, 1]} : vector<8x384xf32> to vector<8x128xf32>
    %27 = vector.extract_strided_slice %23 {offsets = [0, 128], sizes = [8, 128], strides = [1, 1]} : vector<8x384xf32> to vector<8x128xf32>
    %28 = vector.extract_strided_slice %23 {offsets = [0, 256], sizes = [8, 128], strides = [1, 1]} : vector<8x384xf32> to vector<8x128xf32>
    %29 = arith.mulf %27, %10 : vector<8x128xf32>
    %30 = arith.mulf %26, %25 : vector<8x128xf32>
    %31 = arith.addf %29, %30 : vector<8x128xf32>
    %32 = math.tanh %31 : vector<8x128xf32>
    %33 = arith.mulf %28, %32 : vector<8x128xf32>
    %c1_i32 = arith.constant 1 : i32
    %c8_i32_14 = arith.constant 8 : i32
    %34 = arith.muli %c1_i32, %c8_i32_14 : i32
    %35 = tpu.assume_multiple %34, 8 : i32
    %36 = arith.index_cast %35 : i32 to index
    %c0_15 = arith.constant 0 : index
    %37 = vector.load %arg7[%36, %c0_15] : memref<64x512xf32, #tpu.memory_space<vmem>>, vector<8x512xf32>
    %38 = arith.truncf %33 : vector<8x128xf32> to vector<8x128xbf16>
    %cst_16 = arith.constant dense<0.000000e+00> : vector<8x512xf32>
    %39 = tpu.matmul %38, %8, %cst_16 {dimension_numbers = #tpu.dot_dimension_numbers<[1], [0], [0], [1], [0, 0, 1, 1], [], []>} : vector<8x128xbf16>, vector<128x512xbf16>, vector<8x512xf32> -> vector<8x512xf32>
    %40 = arith.addf %37, %39 : vector<8x512xf32>
    %41 = vector.extract_strided_slice %40 {offsets = [0, 0], sizes = [8, 384], strides = [1, 1]} : vector<8x512xf32> to vector<8x384xf32>
    %42 = arith.negf %41 : vector<8x384xf32>
    %43 = math.exp %42 : vector<8x384xf32>
    %cst_17 = arith.constant 1.000000e+00 : f32
    %44 = vector.broadcast %cst_17 : f32 to vector<8x384xf32>
    %45 = arith.addf %44, %43 : vector<8x384xf32>
    %46 = arith.divf %44, %45 : vector<8x384xf32>
    %47 = vector.extract_strided_slice %40 {offsets = [0, 384], sizes = [8, 128], strides = [1, 1]} : vector<8x512xf32> to vector<8x128xf32>
    %48 = math.tanh %47 : vector<8x128xf32>
    %49 = vector.extract_strided_slice %46 {offsets = [0, 0], sizes = [8, 128], strides = [1, 1]} : vector<8x384xf32> to vector<8x128xf32>
    %50 = vector.extract_strided_slice %46 {offsets = [0, 128], sizes = [8, 128], strides = [1, 1]} : vector<8x384xf32> to vector<8x128xf32>
    %51 = vector.extract_strided_slice %46 {offsets = [0, 256], sizes = [8, 128], strides = [1, 1]} : vector<8x384xf32> to vector<8x128xf32>
    %52 = arith.mulf %50, %31 : vector<8x128xf32>
    %53 = arith.mulf %49, %48 : vector<8x128xf32>
    %54 = arith.addf %52, %53 : vector<8x128xf32>
    %55 = math.tanh %54 : vector<8x128xf32>
    %56 = arith.mulf %51, %55 : vector<8x128xf32>
    %c2_i32 = arith.constant 2 : i32
    %c8_i32_18 = arith.constant 8 : i32
    %57 = arith.muli %c2_i32, %c8_i32_18 : i32
    %58 = tpu.assume_multiple %57, 8 : i32
    %59 = arith.index_cast %58 : i32 to index
    %c0_19 = arith.constant 0 : index
    %60 = vector.load %arg7[%59, %c0_19] : memref<64x512xf32, #tpu.memory_space<vmem>>, vector<8x512xf32>
    %61 = arith.truncf %56 : vector<8x128xf32> to vector<8x128xbf16>
    %cst_20 = arith.constant dense<0.000000e+00> : vector<8x512xf32>
    %62 = tpu.matmul %61, %8, %cst_20 {dimension_numbers = #tpu.dot_dimension_numbers<[1], [0], [0], [1], [0, 0, 1, 1], [], []>} : vector<8x128xbf16>, vector<128x512xbf16>, vector<8x512xf32> -> vector<8x512xf32>
    %63 = arith.addf %60, %62 : vector<8x512xf32>
    %64 = vector.extract_strided_slice %63 {offsets = [0, 0], sizes = [8, 384], strides = [1, 1]} : vector<8x512xf32> to vector<8x384xf32>
    %65 = arith.negf %64 : vector<8x384xf32>
    %66 = math.exp %65 : vector<8x384xf32>
    %cst_21 = arith.constant 1.000000e+00 : f32
    %67 = vector.broadcast %cst_21 : f32 to vector<8x384xf32>
    %68 = arith.addf %67, %66 : vector<8x384xf32>
    %69 = arith.divf %67, %68 : vector<8x384xf32>
    %70 = vector.extract_strided_slice %63 {offsets = [0, 384], sizes = [8, 128], strides = [1, 1]} : vector<8x512xf32> to vector<8x128xf32>
    %71 = math.tanh %70 : vector<8x128xf32>
    %72 = vector.extract_strided_slice %69 {offsets = [0, 0], sizes = [8, 128], strides = [1, 1]} : vector<8x384xf32> to vector<8x128xf32>
    %73 = vector.extract_strided_slice %69 {offsets = [0, 128], sizes = [8, 128], strides = [1, 1]} : vector<8x384xf32> to vector<8x128xf32>
    %74 = vector.extract_strided_slice %69 {offsets = [0, 256], sizes = [8, 128], strides = [1, 1]} : vector<8x384xf32> to vector<8x128xf32>
    %75 = arith.mulf %73, %54 : vector<8x128xf32>
    %76 = arith.mulf %72, %71 : vector<8x128xf32>
    %77 = arith.addf %75, %76 : vector<8x128xf32>
    %78 = math.tanh %77 : vector<8x128xf32>
    %79 = arith.mulf %74, %78 : vector<8x128xf32>
    %c3_i32 = arith.constant 3 : i32
    %c8_i32_22 = arith.constant 8 : i32
    %80 = arith.muli %c3_i32, %c8_i32_22 : i32
    %81 = tpu.assume_multiple %80, 8 : i32
    %82 = arith.index_cast %81 : i32 to index
    %c0_23 = arith.constant 0 : index
    %83 = vector.load %arg7[%82, %c0_23] : memref<64x512xf32, #tpu.memory_space<vmem>>, vector<8x512xf32>
    %84 = arith.truncf %79 : vector<8x128xf32> to vector<8x128xbf16>
    %cst_24 = arith.constant dense<0.000000e+00> : vector<8x512xf32>
    %85 = tpu.matmul %84, %8, %cst_24 {dimension_numbers = #tpu.dot_dimension_numbers<[1], [0], [0], [1], [0, 0, 1, 1], [], []>} : vector<8x128xbf16>, vector<128x512xbf16>, vector<8x512xf32> -> vector<8x512xf32>
    %86 = arith.addf %83, %85 : vector<8x512xf32>
    %87 = vector.extract_strided_slice %86 {offsets = [0, 0], sizes = [8, 384], strides = [1, 1]} : vector<8x512xf32> to vector<8x384xf32>
    %88 = arith.negf %87 : vector<8x384xf32>
    %89 = math.exp %88 : vector<8x384xf32>
    %cst_25 = arith.constant 1.000000e+00 : f32
    %90 = vector.broadcast %cst_25 : f32 to vector<8x384xf32>
    %91 = arith.addf %90, %89 : vector<8x384xf32>
    %92 = arith.divf %90, %91 : vector<8x384xf32>
    %93 = vector.extract_strided_slice %86 {offsets = [0, 384], sizes = [8, 128], strides = [1, 1]} : vector<8x512xf32> to vector<8x128xf32>
    %94 = math.tanh %93 : vector<8x128xf32>
    %95 = vector.extract_strided_slice %92 {offsets = [0, 0], sizes = [8, 128], strides = [1, 1]} : vector<8x384xf32> to vector<8x128xf32>
    %96 = vector.extract_strided_slice %92 {offsets = [0, 128], sizes = [8, 128], strides = [1, 1]} : vector<8x384xf32> to vector<8x128xf32>
    %97 = vector.extract_strided_slice %92 {offsets = [0, 256], sizes = [8, 128], strides = [1, 1]} : vector<8x384xf32> to vector<8x128xf32>
    %98 = arith.mulf %96, %77 : vector<8x128xf32>
    %99 = arith.mulf %95, %94 : vector<8x128xf32>
    %100 = arith.addf %98, %99 : vector<8x128xf32>
    %101 = math.tanh %100 : vector<8x128xf32>
    %102 = arith.mulf %97, %101 : vector<8x128xf32>
    %c4_i32 = arith.constant 4 : i32
    %c8_i32_26 = arith.constant 8 : i32
    %103 = arith.muli %c4_i32, %c8_i32_26 : i32
    %104 = tpu.assume_multiple %103, 8 : i32
    %105 = arith.index_cast %104 : i32 to index
    %c0_27 = arith.constant 0 : index
    %106 = vector.load %arg7[%105, %c0_27] : memref<64x512xf32, #tpu.memory_space<vmem>>, vector<8x512xf32>
    %107 = arith.truncf %102 : vector<8x128xf32> to vector<8x128xbf16>
    %cst_28 = arith.constant dense<0.000000e+00> : vector<8x512xf32>
    %108 = tpu.matmul %107, %8, %cst_28 {dimension_numbers = #tpu.dot_dimension_numbers<[1], [0], [0], [1], [0, 0, 1, 1], [], []>} : vector<8x128xbf16>, vector<128x512xbf16>, vector<8x512xf32> -> vector<8x512xf32>
    %109 = arith.addf %106, %108 : vector<8x512xf32>
    %110 = vector.extract_strided_slice %109 {offsets = [0, 0], sizes = [8, 384], strides = [1, 1]} : vector<8x512xf32> to vector<8x384xf32>
    %111 = arith.negf %110 : vector<8x384xf32>
    %112 = math.exp %111 : vector<8x384xf32>
    %cst_29 = arith.constant 1.000000e+00 : f32
    %113 = vector.broadcast %cst_29 : f32 to vector<8x384xf32>
    %114 = arith.addf %113, %112 : vector<8x384xf32>
    %115 = arith.divf %113, %114 : vector<8x384xf32>
    %116 = vector.extract_strided_slice %109 {offsets = [0, 384], sizes = [8, 128], strides = [1, 1]} : vector<8x512xf32> to vector<8x128xf32>
    %117 = math.tanh %116 : vector<8x128xf32>
    %118 = vector.extract_strided_slice %115 {offsets = [0, 0], sizes = [8, 128], strides = [1, 1]} : vector<8x384xf32> to vector<8x128xf32>
    %119 = vector.extract_strided_slice %115 {offsets = [0, 128], sizes = [8, 128], strides = [1, 1]} : vector<8x384xf32> to vector<8x128xf32>
    %120 = vector.extract_strided_slice %115 {offsets = [0, 256], sizes = [8, 128], strides = [1, 1]} : vector<8x384xf32> to vector<8x128xf32>
    %121 = arith.mulf %119, %100 : vector<8x128xf32>
    %122 = arith.mulf %118, %117 : vector<8x128xf32>
    %123 = arith.addf %121, %122 : vector<8x128xf32>
    %124 = math.tanh %123 : vector<8x128xf32>
    %125 = arith.mulf %120, %124 : vector<8x128xf32>
    %c5_i32 = arith.constant 5 : i32
    %c8_i32_30 = arith.constant 8 : i32
    %126 = arith.muli %c5_i32, %c8_i32_30 : i32
    %127 = tpu.assume_multiple %126, 8 : i32
    %128 = arith.index_cast %127 : i32 to index
    %c0_31 = arith.constant 0 : index
    %129 = vector.load %arg7[%128, %c0_31] : memref<64x512xf32, #tpu.memory_space<vmem>>, vector<8x512xf32>
    %130 = arith.truncf %125 : vector<8x128xf32> to vector<8x128xbf16>
    %cst_32 = arith.constant dense<0.000000e+00> : vector<8x512xf32>
    %131 = tpu.matmul %130, %8, %cst_32 {dimension_numbers = #tpu.dot_dimension_numbers<[1], [0], [0], [1], [0, 0, 1, 1], [], []>} : vector<8x128xbf16>, vector<128x512xbf16>, vector<8x512xf32> -> vector<8x512xf32>
    %132 = arith.addf %129, %131 : vector<8x512xf32>
    %133 = vector.extract_strided_slice %132 {offsets = [0, 0], sizes = [8, 384], strides = [1, 1]} : vector<8x512xf32> to vector<8x384xf32>
    %134 = arith.negf %133 : vector<8x384xf32>
    %135 = math.exp %134 : vector<8x384xf32>
    %cst_33 = arith.constant 1.000000e+00 : f32
    %136 = vector.broadcast %cst_33 : f32 to vector<8x384xf32>
    %137 = arith.addf %136, %135 : vector<8x384xf32>
    %138 = arith.divf %136, %137 : vector<8x384xf32>
    %139 = vector.extract_strided_slice %132 {offsets = [0, 384], sizes = [8, 128], strides = [1, 1]} : vector<8x512xf32> to vector<8x128xf32>
    %140 = math.tanh %139 : vector<8x128xf32>
    %141 = vector.extract_strided_slice %138 {offsets = [0, 0], sizes = [8, 128], strides = [1, 1]} : vector<8x384xf32> to vector<8x128xf32>
    %142 = vector.extract_strided_slice %138 {offsets = [0, 128], sizes = [8, 128], strides = [1, 1]} : vector<8x384xf32> to vector<8x128xf32>
    %143 = vector.extract_strided_slice %138 {offsets = [0, 256], sizes = [8, 128], strides = [1, 1]} : vector<8x384xf32> to vector<8x128xf32>
    %144 = arith.mulf %142, %123 : vector<8x128xf32>
    %145 = arith.mulf %141, %140 : vector<8x128xf32>
    %146 = arith.addf %144, %145 : vector<8x128xf32>
    %147 = math.tanh %146 : vector<8x128xf32>
    %148 = arith.mulf %143, %147 : vector<8x128xf32>
    %c6_i32 = arith.constant 6 : i32
    %c8_i32_34 = arith.constant 8 : i32
    %149 = arith.muli %c6_i32, %c8_i32_34 : i32
    %150 = tpu.assume_multiple %149, 8 : i32
    %151 = arith.index_cast %150 : i32 to index
    %c0_35 = arith.constant 0 : index
    %152 = vector.load %arg7[%151, %c0_35] : memref<64x512xf32, #tpu.memory_space<vmem>>, vector<8x512xf32>
    %153 = arith.truncf %148 : vector<8x128xf32> to vector<8x128xbf16>
    %cst_36 = arith.constant dense<0.000000e+00> : vector<8x512xf32>
    %154 = tpu.matmul %153, %8, %cst_36 {dimension_numbers = #tpu.dot_dimension_numbers<[1], [0], [0], [1], [0, 0, 1, 1], [], []>} : vector<8x128xbf16>, vector<128x512xbf16>, vector<8x512xf32> -> vector<8x512xf32>
    %155 = arith.addf %152, %154 : vector<8x512xf32>
    %156 = vector.extract_strided_slice %155 {offsets = [0, 0], sizes = [8, 384], strides = [1, 1]} : vector<8x512xf32> to vector<8x384xf32>
    %157 = arith.negf %156 : vector<8x384xf32>
    %158 = math.exp %157 : vector<8x384xf32>
    %cst_37 = arith.constant 1.000000e+00 : f32
    %159 = vector.broadcast %cst_37 : f32 to vector<8x384xf32>
    %160 = arith.addf %159, %158 : vector<8x384xf32>
    %161 = arith.divf %159, %160 : vector<8x384xf32>
    %162 = vector.extract_strided_slice %155 {offsets = [0, 384], sizes = [8, 128], strides = [1, 1]} : vector<8x512xf32> to vector<8x128xf32>
    %163 = math.tanh %162 : vector<8x128xf32>
    %164 = vector.extract_strided_slice %161 {offsets = [0, 0], sizes = [8, 128], strides = [1, 1]} : vector<8x384xf32> to vector<8x128xf32>
    %165 = vector.extract_strided_slice %161 {offsets = [0, 128], sizes = [8, 128], strides = [1, 1]} : vector<8x384xf32> to vector<8x128xf32>
    %166 = vector.extract_strided_slice %161 {offsets = [0, 256], sizes = [8, 128], strides = [1, 1]} : vector<8x384xf32> to vector<8x128xf32>
    %167 = arith.mulf %165, %146 : vector<8x128xf32>
    %168 = arith.mulf %164, %163 : vector<8x128xf32>
    %169 = arith.addf %167, %168 : vector<8x128xf32>
    %170 = math.tanh %169 : vector<8x128xf32>
    %171 = arith.mulf %166, %170 : vector<8x128xf32>
    %c7_i32 = arith.constant 7 : i32
    %c8_i32_38 = arith.constant 8 : i32
    %172 = arith.muli %c7_i32, %c8_i32_38 : i32
    %173 = tpu.assume_multiple %172, 8 : i32
    %174 = arith.index_cast %173 : i32 to index
    %c0_39 = arith.constant 0 : index
    %175 = vector.load %arg7[%174, %c0_39] : memref<64x512xf32, #tpu.memory_space<vmem>>, vector<8x512xf32>
    %176 = arith.truncf %171 : vector<8x128xf32> to vector<8x128xbf16>
    %cst_40 = arith.constant dense<0.000000e+00> : vector<8x512xf32>
    %177 = tpu.matmul %176, %8, %cst_40 {dimension_numbers = #tpu.dot_dimension_numbers<[1], [0], [0], [1], [0, 0, 1, 1], [], []>} : vector<8x128xbf16>, vector<128x512xbf16>, vector<8x512xf32> -> vector<8x512xf32>
    %178 = arith.addf %175, %177 : vector<8x512xf32>
    %179 = vector.extract_strided_slice %178 {offsets = [0, 0], sizes = [8, 384], strides = [1, 1]} : vector<8x512xf32> to vector<8x384xf32>
    %180 = arith.negf %179 : vector<8x384xf32>
    %181 = math.exp %180 : vector<8x384xf32>
    %cst_41 = arith.constant 1.000000e+00 : f32
    %182 = vector.broadcast %cst_41 : f32 to vector<8x384xf32>
    %183 = arith.addf %182, %181 : vector<8x384xf32>
    %184 = arith.divf %182, %183 : vector<8x384xf32>
    %185 = vector.extract_strided_slice %178 {offsets = [0, 384], sizes = [8, 128], strides = [1, 1]} : vector<8x512xf32> to vector<8x128xf32>
    %186 = math.tanh %185 : vector<8x128xf32>
    %187 = vector.extract_strided_slice %184 {offsets = [0, 0], sizes = [8, 128], strides = [1, 1]} : vector<8x384xf32> to vector<8x128xf32>
    %188 = vector.extract_strided_slice %184 {offsets = [0, 128], sizes = [8, 128], strides = [1, 1]} : vector<8x384xf32> to vector<8x128xf32>
    %189 = vector.extract_strided_slice %184 {offsets = [0, 256], sizes = [8, 128], strides = [1, 1]} : vector<8x384xf32> to vector<8x128xf32>
    %190 = arith.mulf %188, %169 : vector<8x128xf32>
    %191 = arith.mulf %187, %186 : vector<8x128xf32>
    %192 = arith.addf %190, %191 : vector<8x128xf32>
    %193 = math.tanh %192 : vector<8x128xf32>
    %194 = arith.mulf %189, %193 : vector<8x128xf32>
    %c8_i32_42 = arith.constant 8 : i32
    %195 = arith.truncf %194 : vector<8x128xf32> to vector<8x128xbf16>
    %c0_43 = arith.constant 0 : index
    %c0_44 = arith.constant 0 : index
    %196 = vector.load %arg4[%c0_43, %c0_44] : memref<128x128xbf16, #tpu.memory_space<vmem>>, vector<128x128xbf16>
    %cst_45 = arith.constant dense<0.000000e+00> : vector<8x128xf32>
    %197 = tpu.matmul %195, %196, %cst_45 {dimension_numbers = #tpu.dot_dimension_numbers<[1], [0], [0], [1], [0, 0, 1, 1], [], []>} : vector<8x128xbf16>, vector<128x128xbf16>, vector<8x128xf32> -> vector<8x128xf32>
    %c0_46 = arith.constant 0 : index
    %c0_47 = arith.constant 0 : index
    %198 = vector.load %arg5[%c0_46, %c0_47] : memref<1x128xf32, #tpu.memory_space<vmem>>, vector<1x128xf32>
    %199 = vector.broadcast %198 : vector<1x128xf32> to vector<8x128xf32>
    %200 = arith.addf %197, %199 : vector<8x128xf32>
    %c0_48 = arith.constant 0 : index
    %c0_49 = arith.constant 0 : index
    %201 = vector.load %arg6[%c0_48, %c0_49] : memref<8x128xf32, #tpu.memory_space<vmem>>, vector<8x128xf32>
    tpu.vector_store %arg6[%c0_48, %c0_49], %200 {strides = array<i32>} : memref<8x128xf32, #tpu.memory_space<vmem>>, vector<8x128xf32>,
    return
  }
}

</mosaic_0001>

<bundles_post_ra>
// kernel: tpu_custom_call.1
= control target key start
LH: loop header
LB: loop body
LE: loop exit
PB: predicated region body
PF: predicated region fallthrough
CT: control target
= control target key end

     0   :  { %11 = vsyncpa [#allocation4], 0  ;;  %s3134_s0 = inlined_call_operand.hbm [shape: f32[64,256], index: 0, kind: input, shape index: {}]   ;;  %s3135_s1 = inlined_call_operand.hbm [shape: bf16[256,512], index: 1, kind: input, shape index: {}]   ;;  %s3136_s2 = inlined_call_operand.hbm [shape: bf16[128,512], index: 2, kind: input, shape index: {}]   ;;  %s3137_s3 = inlined_call_operand.vmem [shape: f32[1,512], index: 3, kind: input, shape index: {}]   ;;  %s3138_s4 = inlined_call_operand.hbm [shape: bf16[128,128], index: 4, kind: input, shape index: {}]   ;;  %s3139_s5 = inlined_call_operand.vmem [shape: f32[1,128], index: 5, kind: input, shape index: {}]   ;;  %s3140_s6 = inlined_call_operand.hbm [shape: f32[8,128], index: 6, kind: output, shape index: {}]  }
   0x1   :  { %12 = vsyncpa [#allocation7], 0 }
   0x2   :  { %13 = vsyncpa [#allocation10], 0 }
   0x3   :  { %14 = vsyncpa [#allocation5], 0  ;;  %s2550_s21 = smov [#allocation6]   ;;  %s2551_s23 = smov [#allocation3]  }
   0x4   :  { %s32_s22 = sshll.u32 %s2550_s21, 4  ;;  %s20_s24 = sshll.u32 %s2551_s23, 4  ;;  %s33_s22 = int_to_ptr.vmem [resolvable:$true] %s32_s22  ;;  %s21_s24 = int_to_ptr.vmem [resolvable:$true] %s20_s24 }
   0x5   :  { %s2450_s25 = scalar_lea.vmem %s33_s22, 8192  ;;  %p2455_p1 = scmp.lt.s32.totalorder %s33_s22, %s33_s22 }
   0x6   :  { %p2451_p0 = scmp.ne.s32.totalorder %s33_s22, %s2450_s25  ;;  %p2456_p2 = scmp.lt.s32.totalorder %s2450_s25, %s2450_s25 }
   0x8   :  { %p2457_p3 = por %p2456_p2, %p2455_p1 }
   0xa   :  { %p2458_p4 = pnand %p2457_p3, %p2451_p0 }
   0xc   :  { %2461 = shalt.err (!%p2458_p4)
}
   0xd   :  { %s2552_s26 = smov 256   ;;  %s2553_s27 = smov 16  }
   0xe   :  { %38 = dma.hbm_to_vmem [thread:$0]  %s3135_s1, 8192, %s33_s22, [#allocation7], %s2552_s26, %s2552_s26, %s2553_s27  }
   0xf   :  { %s2470_s30 = scalar_lea.vmem %s21_s24, 2048  ;;  %p2475_p6 = scmp.lt.s32.totalorder %s21_s24, %s21_s24 }
  0x10   :  { %p2471_p5 = scmp.ne.s32.totalorder %s21_s24, %s2470_s30  ;;  %p2476_p7 = scmp.lt.s32.totalorder %s2470_s30, %s2470_s30 }
  0x12   :  { %p2477_p8 = por %p2476_p7, %p2475_p6 }
  0x14   :  { %p2478_p9 = pnand %p2477_p8, %p2471_p5 }
  0x16   :  { %2481 = shalt.err (!%p2478_p9)
}
  0x17   :  { %26 = dma.hbm_to_vmem [thread:$0]  %s3134_s0, 2048, %s21_s24, [#allocation4], %s2552_s26, %s2552_s26, %s2553_s27  }
  0x18   :  { %s2554_s9 = smov [#allocation8]   ;;  %s2555_s11 = smov [#allocation9]  }
  0x19   :  { %s44_s10 = sshll.u32 %s2554_s9, 4  ;;  %s58_s12 = sshll.u32 %s2555_s11, 4  ;;  %s45_s10 = int_to_ptr.vmem [resolvable:$true] %s44_s10  ;;  %s59_s12 = int_to_ptr.vmem [resolvable:$true] %s58_s12 }
  0x1a   :  { %s2490_s13 = scalar_lea.vmem %s45_s10, 4096  ;;  %p2495_p11 = scmp.lt.s32.totalorder %s45_s10, %s45_s10 }
  0x1b   :  { %p2491_p10 = scmp.ne.s32.totalorder %s45_s10, %s2490_s13  ;;  %p2496_p12 = scmp.lt.s32.totalorder %s2490_s13, %s2490_s13 }
  0x1d   :  { %p2497_p13 = por %p2496_p12, %p2495_p11 }
  0x1f   :  { %p2498_p0 = pnand %p2497_p13, %p2491_p10 }
  0x21   :  { %2501 = shalt.err (!%p2498_p0)
}
  0x22   :  { %50 = dma.hbm_to_vmem [thread:$0]  %s3136_s2, 4096, %s45_s10, [#allocation7], %s2552_s26, %s2552_s26, %s2553_s27  }
  0x23   :  { %s2510_s15 = scalar_lea.vmem %s59_s12, 1024  ;;  %p2515_p2 = scmp.lt.s32.totalorder %s59_s12, %s59_s12 }
  0x24   :  { %p2511_p1 = scmp.ne.s32.totalorder %s59_s12, %s2510_s15  ;;  %p2516_p3 = scmp.lt.s32.totalorder %s2510_s15, %s2510_s15 }
  0x26   :  { %p2517_p4 = por %p2516_p3, %p2515_p2 }
  0x28   :  { %p2518_p5 = pnand %p2517_p4, %p2511_p1 }
  0x2a   :  { %2521 = shalt.err (!%p2518_p5)
}
  0x2b   :  { %s2556_s0 = smov 64   ;;  %s2557_s16 = smov 4  }
  0x2c   :  { %64 = dma.hbm_to_vmem [thread:$0]  %s3138_s4, 1024, %s59_s12, [#allocation10], %s2556_s0, %s2556_s0, %s2557_s16  }
  0x2d   :  { %2542 = dma.done.wait [#allocation4], 2048  }
  0x2e   :  { %2543 = vsyncadd [#allocation4], 4294965248 }
  0x2f   :  { %2544 = dma.done.wait [#allocation7], 12288  }
  0x30   :  { %2545 = vsyncadd [#allocation7], 4294955008 }
  0x31   :  { %2546 = dma.done.wait [#allocation10], 1024  }
  0x32   :  { %2547 = vsyncadd [#allocation10], 4294966272  ;;  %v2130_v0 = vld [vmem:[#allocation6 + $0xe4] ss:$16 sps:$4 sm:$0xff]   ;;  %v2132_v1 = vld [vmem:[#allocation6 + $0xec] ss:$16 sps:$4 sm:$0xff]  }
  0x33   :  { %510 = vmatprep.subr.bf16.mxu0 %v2130_v0  ;;  %v2134_v2 = vld [vmem:[#allocation6 + $0xe0] ss:$16 sps:$4 sm:$0xff]   ;;  %v2135_v3 = vld [vmem:[#allocation6 + $0xe8] ss:$16 sps:$4 sm:$0xff]   ;;  %583 = vmatprep.subr.bf16.mxu1 %v2132_v1  ;;  %v2136_v4 = vld [vmem:[#allocation6 + $0xc4] ss:$16 sps:$4 sm:$0xff]  }
  0x34   :  { %511 = vmatpush1.bf16.msra.mxu0 %v2134_v2  ;;  %584 = vmatpush1.bf16.msra.mxu1 %v2135_v3  ;;  %v2138_v5 = vld [vmem:[#allocation6 + $0xcc] ss:$16 sps:$4 sm:$0xff]   ;;  %v2140_v6 = vld [vmem:[#allocation6 + $0xc0] ss:$16 sps:$4 sm:$0xff]   ;;  %v2141_v7 = vld [vmem:[#allocation6 + $0xc8] ss:$16 sps:$4 sm:$0xff]  }
  0x35   :  { %512 = vmatprep.subr.bf16.mxu0 %v2136_v4  ;;  %585 = vmatprep.subr.bf16.mxu1 %v2138_v5  ;;  %v2142_v8 = vld [vmem:[#allocation6 + $0xa4] ss:$16 sps:$4 sm:$0xff]   ;;  %v2144_v9 = vld [vmem:[#allocation6 + $0xac] ss:$16 sps:$4 sm:$0xff]   ;;  %v2146_v10 = vld [vmem:[#allocation6 + $0xa0] ss:$16 sps:$4 sm:$0xff]  }
  0x36   :  { %v2147_v11 = vld [vmem:[#allocation6 + $0xa8] ss:$16 sps:$4 sm:$0xff]   ;;  %v2148_v12 = vld [vmem:[#allocation6 + $0x84] ss:$16 sps:$4 sm:$0xff]   ;;  %v2150_v13 = vld [vmem:[#allocation6 + $0x8c] ss:$16 sps:$4 sm:$0xff]  }
  0x37   :  { %v2152_v14 = vld [vmem:[#allocation6 + $0x80] ss:$16 sps:$4 sm:$0xff]   ;;  %v2153_v15 = vld [vmem:[#allocation6 + $0x88] ss:$16 sps:$4 sm:$0xff]   ;;  %v2154_v16 = vld [vmem:[#allocation6 + $0x64] ss:$16 sps:$4 sm:$0xff]  }
  0x38   :  { %513 = vmatpush1.bf16.msra.mxu0 %v2140_v6  ;;  %586 = vmatpush1.bf16.msra.mxu1 %v2141_v7  ;;  %v2156_v17 = vld [vmem:[#allocation6 + $0x6c] ss:$16 sps:$4 sm:$0xff]   ;;  %v2158_v18 = vld [vmem:[#allocation6 + $0x60] ss:$16 sps:$4 sm:$0xff]   ;;  %v2159_v19 = vld [vmem:[#allocation6 + $0x68] ss:$16 sps:$4 sm:$0xff]  }
  0x39   :  { %514 = vmatprep.subr.bf16.mxu0 %v2142_v8  ;;  %587 = vmatprep.subr.bf16.mxu1 %v2144_v9  ;;  %v2160_v20 = vld [vmem:[#allocation6 + $0x44] ss:$16 sps:$4 sm:$0xff]   ;;  %v2162_v21 = vld [vmem:[#allocation6 + $0x4c] ss:$16 sps:$4 sm:$0xff]   ;;  %v2164_v22 = vld [vmem:[#allocation6 + $0x40] ss:$16 sps:$4 sm:$0xff]  }
  0x3a   :  { %v2165_v23 = vld [vmem:[#allocation6 + $0x48] ss:$16 sps:$4 sm:$0xff]   ;;  %v2166_v24 = vld [vmem:[#allocation6 + $0x24] ss:$16 sps:$4 sm:$0xff]   ;;  %v2168_v25 = vld [vmem:[#allocation6 + $0x2c] ss:$16 sps:$4 sm:$0xff]  }
  0x3b   :  { %v2170_v26 = vld [vmem:[#allocation6 + $0x20] ss:$16 sps:$4 sm:$0xff]   ;;  %v2171_v27 = vld [vmem:[#allocation6 + $0x28] ss:$16 sps:$4 sm:$0xff]   ;;  %v2172_v28 = vld [vmem:[#allocation6 + $0x4] ss:$16 sps:$4 sm:$0xff]  }
  0x3c   :  { %515 = vmatpush1.bf16.msra.mxu0 %v2146_v10  ;;  %588 = vmatpush1.bf16.msra.mxu1 %v2147_v11  ;;  %v2174_v29 = vld [vmem:[#allocation6 + $0xc] ss:$16 sps:$4 sm:$0xff]   ;;  %v2176_v30 = vld [vmem:[#allocation6] ss:$16 sps:$4 sm:$0xff]   ;;  %v2177_v31 = vld [vmem:[#allocation6 + $0x8] ss:$16 sps:$4 sm:$0xff]  }
  0x3d   :  { %516 = vmatprep.subr.bf16.mxu0 %v2148_v12  ;;  %589 = vmatprep.subr.bf16.mxu1 %v2150_v13  ;;  %v2178_v32 = vld [vmem:[#allocation6 + $0x1e4] ss:$16 sps:$4 sm:$0xff]   ;;  %v2180_v33 = vld [vmem:[#allocation6 + $0x1ec] ss:$16 sps:$4 sm:$0xff]   ;;  %v2182_v34 = vld [vmem:[#allocation6 + $0x1e0] ss:$16 sps:$4 sm:$0xff]  }
  0x3e   :  { %v2183_v35 = vld [vmem:[#allocation6 + $0x1e8] ss:$16 sps:$4 sm:$0xff]   ;;  %v2184_v36 = vld [vmem:[#allocation6 + $0x1c4] ss:$16 sps:$4 sm:$0xff]   ;;  %v2186_v37 = vld [vmem:[#allocation6 + $0x1cc] ss:$16 sps:$4 sm:$0xff]  }
  0x3f   :  { %v2188_v38 = vld [vmem:[#allocation6 + $0x1c0] ss:$16 sps:$4 sm:$0xff]   ;;  %v2189_v39 = vld [vmem:[#allocation6 + $0x1c8] ss:$16 sps:$4 sm:$0xff]   ;;  %v2190_v40 = vld [vmem:[#allocation6 + $0x1a4] ss:$16 sps:$4 sm:$0xff]  }
  0x40   :  { %517 = vmatpush1.bf16.msra.mxu0 %v2152_v14  ;;  %590 = vmatpush1.bf16.msra.mxu1 %v2153_v15  ;;  %v2192_v41 = vld [vmem:[#allocation6 + $0x1ac] ss:$16 sps:$4 sm:$0xff]   ;;  %v2194_v42 = vld [vmem:[#allocation6 + $0x1a0] ss:$16 sps:$4 sm:$0xff]   ;;  %v2195_v43 = vld [vmem:[#allocation6 + $0x1a8] ss:$16 sps:$4 sm:$0xff]  }
  0x41   :  { %518 = vmatprep.subr.bf16.mxu0 %v2154_v16  ;;  %591 = vmatprep.subr.bf16.mxu1 %v2156_v17  ;;  %v2196_v44 = vld [vmem:[#allocation6 + $0x184] ss:$16 sps:$4 sm:$0xff]   ;;  %v2198_v45 = vld [vmem:[#allocation6 + $0x18c] ss:$16 sps:$4 sm:$0xff]   ;;  %v2200_v47 = vld [vmem:[#allocation6 + $0x180] ss:$16 sps:$4 sm:$0xff]  }
  0x42   :  { %v81_v46 = vld [vmem:[#allocation3 + $0x8] sm:$0xff]  ;;  %v83_v49 = vld [vmem:[#allocation3 + $0x18] sm:$0xff]  ;;  %v2202_v50 = vld [vmem:[#allocation6 + $0x164] ss:$16 sps:$4 sm:$0xff]   ;;  %vm2560_vm0 = vmmov 0   ;;  %s2561_s20 = smov [#allocation11]  }
  0x43   :  { %v2201_v48 = vld [vmem:[#allocation6 + $0x188] ss:$16 sps:$4 sm:$0xff]   ;;  %v97_v51 = vpack.c.bf16 %v83_v49, %v81_v46  ;;  %v2204_v52 = vld [vmem:[#allocation6 + $0x16c] ss:$16 sps:$4 sm:$0xff]   ;;  %v2206_v53 = vld [vmem:[#allocation6 + $0x160] ss:$16 sps:$4 sm:$0xff]  }
  0x44   :  { %519 = vmatpush1.bf16.msra.mxu0 %v2158_v18  ;;  %592 = vmatpush1.bf16.msra.mxu1 %v2159_v19  ;;  %v2207_v54 = vld [vmem:[#allocation6 + $0x168] ss:$16 sps:$4 sm:$0xff]   ;;  %v2208_v55 = vld [vmem:[#allocation6 + $0x144] ss:$16 sps:$4 sm:$0xff]   ;;  %v2210_v56 = vld [vmem:[#allocation6 + $0x14c] ss:$16 sps:$4 sm:$0xff]  }
  0x45   :  { %520 = vmatprep.subr.bf16.mxu0 %v2160_v20  ;;  %593 = vmatprep.subr.bf16.mxu1 %v2162_v21  ;;  %v2212_v57 = vld [vmem:[#allocation6 + $0x140] ss:$16 sps:$4 sm:$0xff]   ;;  %v2213_v58 = vld [vmem:[#allocation6 + $0x148] ss:$16 sps:$4 sm:$0xff]   ;;  %v2214_v59 = vld [vmem:[#allocation6 + $0x124] ss:$16 sps:$4 sm:$0xff]  }
  0x46   :  { %542 = vmatprep.mubr.bf16.mxu0 %v97_v51  ;;  %615 = vmatprep.mubr.bf16.mxu1 %v97_v51  ;;  %v2216_v60 = vld [vmem:[#allocation6 + $0x12c] ss:$16 sps:$4 sm:$0xff]   ;;  %v2218_v61 = vld [vmem:[#allocation6 + $0x120] ss:$16 sps:$4 sm:$0xff]   ;;  %v2219_v62 = vld [vmem:[#allocation6 + $0x128] ss:$16 sps:$4 sm:$0xff]  }
  0x47   :  { %v2220_v63 = vld [vmem:[#allocation6 + $0x104] ss:$16 sps:$4 sm:$0xff]   ;;  %v2222_v0 = vld [vmem:[#allocation6 + $0x10c] ss:$16 sps:$4 sm:$0xff]   ;;  %v2224_v1 = vld [vmem:[#allocation6 + $0x100] ss:$16 sps:$4 sm:$0xff]  }
  0x48   :  { %521 = vmatpush1.bf16.msra.mxu0 %v2164_v22  ;;  %594 = vmatpush1.bf16.msra.mxu1 %v2165_v23  ;;  %v2225_v2 = vld [vmem:[#allocation6 + $0x108] ss:$16 sps:$4 sm:$0xff]   ;;  %v80_v3 = vld [vmem:[#allocation3] sm:$0xff]  ;;  %v82_v4 = vld [vmem:[#allocation3 + $0x10] sm:$0xff]  ;;  %s1942_s21 = sshll.u32 %s2561_s20, 4  ;;  %s1943_s21 = int_to_ptr.vmem [resolvable:$true] %s1942_s21 }
  0x49   :  { %522 = vmatprep.subr.bf16.mxu0 %v2166_v24  ;;  %595 = vmatprep.subr.bf16.mxu1 %v2168_v25  ;;  %v2609_v5 = vld [vmem:[#allocation8 + $0xe4] ss:$16 sps:$4 sm:$0xff]   ;;  %v2611_v6 = vld [vmem:[#allocation8 + $0xec] ss:$16 sps:$4 sm:$0xff]   ;;  %v2613_v7 = vld [vmem:[#allocation8 + $0xe0] ss:$16 sps:$4 sm:$0xff]   ;;  %v96_v8 = vpack.c.bf16 %v82_v4, %v80_v3  ;;  %p2527_p7 = scmp.lt.s32.totalorder %s1943_s21, %s1943_s21 }
  0x4a   :  { %v2615_v9 = vld [vmem:[#allocation8 + $0xe8] ss:$16 sps:$4 sm:$0xff]   ;;  %v2617_v12 = vld [vmem:[#allocation8 + $0xc4] ss:$16 sps:$4 sm:$0xff]   ;;  %v2621_v13 = vld [vmem:[#allocation8 + $0xcc] ss:$16 sps:$4 sm:$0xff]  }
  0x4b   :  { %v85_v10 = vld [vmem:[#allocation3 + $0x28] sm:$0xff]  ;;  %v87_v11 = vld [vmem:[#allocation3 + $0x38] sm:$0xff]  ;;  %v2623_v14 = vld [vmem:[#allocation8 + $0xc0] ss:$16 sps:$4 sm:$0xff]   ;;  %s2522_s22 = scalar_lea.vmem %s1943_s21, 128 }
  0x4c   :  { %523 = vmatpush1.bf16.msra.mxu0 %v2170_v26  ;;  %596 = vmatpush1.bf16.msra.mxu1 %v2171_v27  ;;  %v2625_v15 = vld [vmem:[#allocation8 + $0xc8] ss:$16 sps:$4 sm:$0xff]   ;;  %v99_v16 = vpack.c.bf16 %v87_v11, %v85_v10  ;;  %v84_v17 = vld [vmem:[#allocation3 + $0x20] sm:$0xff]  ;;  %v86_v18 = vld [vmem:[#allocation3 + $0x30] sm:$0xff]  ;;  %p2523_p6 = scmp.ne.s32.totalorder %s1943_s21, %s2522_s22  ;;  %p2528_p8 = scmp.lt.s32.totalorder %s2522_s22, %s2522_s22 }
  0x4d   :  { %524 = vmatprep.subr.bf16.mxu0 %v2172_v28  ;;  %597 = vmatprep.subr.bf16.mxu1 %v2174_v29  ;;  %v2629_v19 = vld [vmem:[#allocation8 + $0xa4] ss:$16 sps:$4 sm:$0xff]   ;;  %v2631_v20 = vld [vmem:[#allocation8 + $0xac] ss:$16 sps:$4 sm:$0xff]   ;;  %v2635_v23 = vld [vmem:[#allocation8 + $0xa0] ss:$16 sps:$4 sm:$0xff]   ;;  %v98_v25 = vpack.c.bf16 %v86_v18, %v84_v17 }
  0x4e   :  { %v89_v21 = vld [vmem:[#allocation3 + $0x48] sm:$0xff]  ;;  %v91_v22 = vld [vmem:[#allocation3 + $0x58] sm:$0xff]  ;;  %v2639_v26 = vld [vmem:[#allocation8 + $0x84] ss:$16 sps:$4 sm:$0xff]   ;;  %p2529_p9 = por %p2528_p8, %p2527_p7 }
  0x4f   :  { %v2637_v24 = vld [vmem:[#allocation8 + $0xa8] ss:$16 sps:$4 sm:$0xff]   ;;  %v2641_v27 = vld [vmem:[#allocation8 + $0x8c] ss:$16 sps:$4 sm:$0xff]   ;;  %v101_v28 = vpack.c.bf16 %v91_v22, %v89_v21  ;;  %v2647_v29 = vld [vmem:[#allocation8 + $0x80] ss:$16 sps:$4 sm:$0xff]  }
  0x50   :  { %525 = vmatpush1.bf16.msra.mxu0 %v2176_v30  ;;  %598 = vmatpush1.bf16.msra.mxu1 %v2177_v31  ;;  %v2651_v30 = vld [vmem:[#allocation8 + $0x88] ss:$16 sps:$4 sm:$0xff]   ;;  %v88_v31 = vld [vmem:[#allocation3 + $0x40] sm:$0xff]  ;;  %v94_v46 = vld [vmem:[#allocation3 + $0x70] sm:$0xff]  ;;  %p2530_p10 = pnand %p2529_p9, %p2523_p6 }
  0x51   :  { %526 = vmatprep.subr.bf16.mxu0 %v2178_v32  ;;  %599 = vmatprep.subr.bf16.mxu1 %v2180_v33  ;;  %v90_v32 = vld [vmem:[#allocation3 + $0x50] sm:$0xff]  ;;  %v2687_v51 = vld [vmem:[#allocation8 + $0x28] ss:$16 sps:$4 sm:$0xff]  }
  0x52   :  { %v2655_v33 = vld [vmem:[#allocation8 + $0x64] ss:$16 sps:$4 sm:$0xff]  }
  0x54   :  { %527 = vmatpush2.bf16.msra.mxu0 %v2182_v34  ;;  %600 = vmatpush2.bf16.msra.mxu1 %v2183_v35  ;;  %v2657_v34 = vld [vmem:[#allocation8 + $0x6c] ss:$16 sps:$4 sm:$0xff]   ;;  %v100_v35 = vpack.c.bf16 %v90_v32, %v88_v31 }
  0x55   :  { %528 = vmatprep.subr.bf16.mxu0 %v2184_v36  ;;  %601 = vmatprep.subr.bf16.mxu1 %v2186_v37  ;;  %v93_v36 = vld [vmem:[#allocation3 + $0x68] sm:$0xff]  ;;  %v95_v37 = vld [vmem:[#allocation3 + $0x78] sm:$0xff] }
  0x58   :  { %529 = vmatpush2.bf16.msra.mxu0 %v2188_v38  ;;  %602 = vmatpush2.bf16.msra.mxu1 %v2189_v39  ;;  %v2661_v38 = vld [vmem:[#allocation8 + $0x60] ss:$16 sps:$4 sm:$0xff]   ;;  %v2663_v39 = vld [vmem:[#allocation8 + $0x68] ss:$16 sps:$4 sm:$0xff]  }
  0x59   :  { %530 = vmatprep.subr.bf16.mxu0 %v2190_v40  ;;  %603 = vmatprep.subr.bf16.mxu1 %v2192_v41  ;;  %v2667_v40 = vld [vmem:[#allocation8 + $0x44] ss:$16 sps:$4 sm:$0xff]   ;;  %v2669_v41 = vld [vmem:[#allocation8 + $0x4c] ss:$16 sps:$4 sm:$0xff]  }
  0x5c   :  { %531 = vmatpush2.bf16.msra.mxu0 %v2194_v42  ;;  %604 = vmatpush2.bf16.msra.mxu1 %v2195_v43  ;;  %v103_v42 = vpack.c.bf16 %v95_v37, %v93_v36  ;;  %v2671_v43 = vld [vmem:[#allocation8 + $0x40] ss:$16 sps:$4 sm:$0xff]  }
  0x5d   :  { %532 = vmatprep.subr.bf16.mxu0 %v2196_v44  ;;  %605 = vmatprep.subr.bf16.mxu1 %v2198_v45  ;;  %v2675_v44 = vld [vmem:[#allocation8 + $0x48] ss:$16 sps:$4 sm:$0xff]   ;;  %v92_v45 = vld [vmem:[#allocation3 + $0x60] sm:$0xff] }
  0x5e   :  { %v102_v49 = vpack.c.bf16 %v94_v46, %v92_v45 }
  0x60   :  { %533 = vmatpush2.bf16.msra.mxu0 %v2200_v47  ;;  %606 = vmatpush2.bf16.msra.mxu1 %v2201_v48  ;;  %v2679_v47 = vld [vmem:[#allocation8 + $0x24] ss:$16 sps:$4 sm:$0xff]   ;;  %v2681_v48 = vld [vmem:[#allocation8 + $0x2c] ss:$16 sps:$4 sm:$0xff]  }
  0x61   :  { %534 = vmatprep.subr.bf16.mxu0 %v2202_v50  ;;  %607 = vmatprep.subr.bf16.mxu1 %v2204_v52  ;;  %v2685_v50 = vld [vmem:[#allocation8 + $0x20] ss:$16 sps:$4 sm:$0xff]   ;;  %v2691_v52 = vld [vmem:[#allocation8 + $0x4] ss:$16 sps:$4 sm:$0xff]  }
  0x64   :  { %535 = vmatpush2.bf16.msra.mxu0 %v2206_v53  ;;  %608 = vmatpush2.bf16.msra.mxu1 %v2207_v54  ;;  %v2693_v53 = vld [vmem:[#allocation8 + $0xc] ss:$16 sps:$4 sm:$0xff]   ;;  %v2697_v54 = vld [vmem:[#allocation8] ss:$16 sps:$4 sm:$0xff]  }
  0x65   :  { %536 = vmatprep.subr.bf16.mxu0 %v2208_v55  ;;  %609 = vmatprep.subr.bf16.mxu1 %v2210_v56  ;;  %v2699_v55 = vld [vmem:[#allocation8 + $0x8] ss:$16 sps:$4 sm:$0xff]   ;;  %v3141_v56 = vmov 0  }
  0x68   :  { %537 = vmatpush2.bf16.msra.mxu0 %v2212_v57  ;;  %610 = vmatpush2.bf16.msra.mxu1 %v2213_v58  ;;  %v170_v57 = vlaneseq }
  0x69   :  { %538 = vmatprep.subr.bf16.mxu0 %v2214_v59  ;;  %611 = vmatprep.subr.bf16.mxu1 %v2216_v60 }
  0x6a   :  { %v171_v58 = vshrl.u32 %v170_v57, 7 }
  0x6c   :  { %539 = vmatpush2.bf16.msra.mxu0 %v2218_v61  ;;  %612 = vmatpush2.bf16.msra.mxu1 %v2219_v62  ;;  %v180_v59 = vsub.s32 2, %v171_v58  ;;  %v172_v60 = vsub.s32 0, %v171_v58  ;;  %v184_v61 = vsub.s32 3, %v171_v58  ;;  %v168_v62 = vld [vmem:[%s3137_s3] sm:$0xf] }
  0x6d   :  { %540 = vmatprep.subr.bf16.mxu0 %v2220_v63  ;;  %613 = vmatprep.subr.bf16.mxu1 %v2222_v0 }
  0x6e   :  { %v2758_v10 = vrot.slane %v168_v62, %v184_v61 }
  0x70   :  { %541 = vmatpush2.bf16.msra.mxu0 %v2224_v1  ;;  %614 = vmatpush2.bf16.msra.mxu1 %v2225_v2  ;;  %v2752_v1 = vrot.slane %v168_v62, %v180_v59  ;;  %v176_v2 = vsub.s32 1, %v171_v58 }
  0x71   :  { %887 = vmatprep.subr.bf16.mxu0 %v2609_v5  ;;  %928 = vmatprep.subr.bf16.mxu1 %v2611_v6 }
  0x72   :  { %v177_v17 = vrot.slane %v168_v62, %v176_v2 }
  0x73   :  { %543 = vmatmul.mubr.bf16.vlgmr.msra.gmra.mxu0 %v96_v8  ;;  %616 = vmatmul.mubr.bf16.vlgmr.msra.gmra.mxu1 %v96_v8  ;;  %v173_v8 = vrot.slane %v168_v62, %v172_v60 }
  0x74   :  { %888 = vmatpush1.bf16.msra.mxu0 %v2613_v7  ;;  %929 = vmatpush1.bf16.msra.mxu1 %v2615_v9 }
  0x75   :  { %889 = vmatprep.subr.bf16.mxu0 %v2617_v12  ;;  %930 = vmatprep.subr.bf16.mxu1 %v2621_v13 }
  0x76   :  { %552 = vmatprep.mubr.bf16.mxu0 %v99_v16  ;;  %625 = vmatprep.mubr.bf16.mxu1 %v99_v16 }
  0x78   :  { %890 = vmatpush1.bf16.msra.mxu0 %v2623_v14  ;;  %931 = vmatpush1.bf16.msra.mxu1 %v2625_v15 }
  0x79   :  { %891 = vmatprep.subr.bf16.mxu0 %v2629_v19  ;;  %932 = vmatprep.subr.bf16.mxu1 %v2631_v20 }
  0x7b   :  { %553 = vmatmul.mubr.bf16.gmra.mxu0 %v98_v25  ;;  %626 = vmatmul.mubr.bf16.gmra.mxu1 %v98_v25 }
  0x7c   :  { %892 = vmatpush1.bf16.msra.mxu0 %v2635_v23  ;;  %933 = vmatpush1.bf16.msra.mxu1 %v2637_v24 }
  0x7d   :  { %893 = vmatprep.subr.bf16.mxu0 %v2639_v26  ;;  %934 = vmatprep.subr.bf16.mxu1 %v2641_v27 }
  0x7e   :  { %562 = vmatprep.mubr.bf16.mxu0 %v101_v28  ;;  %635 = vmatprep.mubr.bf16.mxu1 %v101_v28 }
  0x80   :  { %894 = vmatpush1.bf16.msra.mxu0 %v2647_v29  ;;  %935 = vmatpush1.bf16.msra.mxu1 %v2651_v30 }
  0x81   :  { %895 = vmatprep.subr.bf16.mxu0 %v2655_v33  ;;  %936 = vmatprep.subr.bf16.mxu1 %v2657_v34 }
  0x83   :  { %563 = vmatmul.mubr.bf16.gmra.mxu0 %v100_v35  ;;  %636 = vmatmul.mubr.bf16.gmra.mxu1 %v100_v35 }
  0x84   :  { %896 = vmatpush1.bf16.msra.mxu0 %v2661_v38  ;;  %937 = vmatpush1.bf16.msra.mxu1 %v2663_v39 }
  0x85   :  { %897 = vmatprep.subr.bf16.mxu0 %v2667_v40  ;;  %938 = vmatprep.subr.bf16.mxu1 %v2669_v41 }
  0x86   :  { %572 = vmatprep.mubr.bf16.mxu0 %v103_v42  ;;  %645 = vmatprep.mubr.bf16.mxu1 %v103_v42 }
  0x88   :  { %898 = vmatpush1.bf16.msra.mxu0 %v2671_v43  ;;  %939 = vmatpush1.bf16.msra.mxu1 %v2675_v44 }
  0x89   :  { %899 = vmatprep.subr.bf16.mxu0 %v2679_v47  ;;  %940 = vmatprep.subr.bf16.mxu1 %v2681_v48 }
  0x8b   :  { %573 = vmatmul.mubr.bf16.gmra.mxu0 %v102_v49  ;;  %646 = vmatmul.mubr.bf16.gmra.mxu1 %v102_v49 }
  0x8c   :  { %900 = vmatpush1.bf16.msra.mxu0 %v2685_v50  ;;  %941 = vmatpush1.bf16.msra.mxu1 %v2687_v51 }
  0x8d   :  { %901 = vmatprep.subr.bf16.mxu0 %v2691_v52  ;;  %942 = vmatprep.subr.bf16.mxu1 %v2693_v53 }
  0x8e   :  { %919 = vmatprep.mubr.bf16.mxu0 %v3141_v56  ;;  %960 = vmatprep.mubr.bf16.mxu1 %v3141_v56 }
  0x90   :  { %902 = vmatpush1.bf16.msra.mxu0 %v2697_v54  ;;  %943 = vmatpush1.bf16.msra.mxu1 %v2699_v55 }
  0x91   :  { %1005 = vmatprep.subr.bf16.mxu0 %v2609_v5  ;;  %1046 = vmatprep.subr.bf16.mxu1 %v2611_v6 }
  0x93   :  { %920 = vmatmul.mubr.bf16.vlgmr.msra.gmra.mxu0 %v3141_v56  ;;  %961 = vmatmul.mubr.bf16.vlgmr.msra.gmra.mxu1 %v3141_v56 }
  0x94   :  { %1006 = vmatpush1.bf16.msra.mxu0 %v2613_v7  ;;  %1047 = vmatpush1.bf16.msra.mxu1 %v2615_v9 }
  0x95   :  { %1007 = vmatprep.subr.bf16.mxu0 %v2617_v12  ;;  %1048 = vmatprep.subr.bf16.mxu1 %v2621_v13 }
  0x96   :  { %1037 = vmatprep.mubr.bf16.mxu0 %v3141_v56  ;;  %1078 = vmatprep.mubr.bf16.mxu1 %v3141_v56 }
  0x98   :  { %1008 = vmatpush1.bf16.msra.mxu0 %v2623_v14  ;;  %1049 = vmatpush1.bf16.msra.mxu1 %v2625_v15 }
  0x99   :  { %1009 = vmatprep.subr.bf16.mxu0 %v2629_v19  ;;  %1050 = vmatprep.subr.bf16.mxu1 %v2631_v20 }
  0x9c   :  { %1010 = vmatpush1.bf16.msra.mxu0 %v2635_v23  ;;  %1051 = vmatpush1.bf16.msra.mxu1 %v2637_v24 }
  0x9d   :  { %1011 = vmatprep.subr.bf16.mxu0 %v2639_v26  ;;  %1052 = vmatprep.subr.bf16.mxu1 %v2641_v27 }
  0xa0   :  { %1012 = vmatpush1.bf16.msra.mxu0 %v2647_v29  ;;  %1053 = vmatpush1.bf16.msra.mxu1 %v2651_v30 }
  0xa1   :  { %1013 = vmatprep.subr.bf16.mxu0 %v2655_v33  ;;  %1054 = vmatprep.subr.bf16.mxu1 %v2657_v34 }
  0xa4   :  { %1014 = vmatpush1.bf16.msra.mxu0 %v2661_v38  ;;  %1055 = vmatpush1.bf16.msra.mxu1 %v2663_v39 }
  0xa5   :  { %1015 = vmatprep.subr.bf16.mxu0 %v2667_v40  ;;  %1056 = vmatprep.subr.bf16.mxu1 %v2669_v41 }
  0xa8   :  { %1016 = vmatpush1.bf16.msra.mxu0 %v2671_v43  ;;  %1057 = vmatpush1.bf16.msra.mxu1 %v2675_v44 }
  0xa9   :  { %1017 = vmatprep.subr.bf16.mxu0 %v2679_v47  ;;  %1058 = vmatprep.subr.bf16.mxu1 %v2681_v48 }
  0xac   :  { %1018 = vmatpush1.bf16.msra.mxu0 %v2685_v50  ;;  %1059 = vmatpush1.bf16.msra.mxu1 %v2687_v51 }
  0xad   :  { %1019 = vmatprep.subr.bf16.mxu0 %v2691_v52  ;;  %1060 = vmatprep.subr.bf16.mxu1 %v2693_v53 }
  0xb0   :  { %1020 = vmatpush1.bf16.msra.mxu0 %v2697_v54  ;;  %1061 = vmatpush1.bf16.msra.mxu1 %v2699_v55 }
  0xb1   :  { %1123 = vmatprep.subr.bf16.mxu0 %v2609_v5  ;;  %1164 = vmatprep.subr.bf16.mxu1 %v2611_v6 }
 0x133   :  { %v2748_v63 = vpop.f32.mrf.mxu0  ;;  %v2750_v0 = vpop.f32.mrf.mxu1 }
 0x135   :  { %v2754_v3 = vpop.f32.mrf.mxu0  ;;  %v2756_v4 = vpop.f32.mrf.mxu1 }
 0x137   :  { %v548_v11 = vpop.f32.mrf.mxu0  ;;  %v621_v16 = vpop.f32.mrf.mxu1 }
 0x138   :  { %v2760_v18 = vadd.f32 %v548_v11, %v173_v8  ;;  %v2763_v21 = vadd.f32 %v621_v16, %v2752_v1 }
 0x139   :  { %v550_v22 = vpop.f32.mrf.mxu0  ;;  %v623_v25 = vpop.f32.mrf.mxu1 }
 0x13a   :  { %v2765_v28 = vadd.f32 %v550_v22, %v177_v17  ;;  %v2768_v31 = vadd.f32 %v623_v25, %v2758_v10 }
 0x13b   :  { %v554_v32 = vpop.f32.mrf.mxu0  ;;  %v627_v35 = vpop.f32.mrf.mxu1 }
 0x13c   :  { %v2770_v36 = vadd.f32 %v554_v32, %v173_v8  ;;  %v2773_v37 = vadd.f32 %v627_v35, %v2752_v1 }
 0x13d   :  { %v556_v42 = vpop.f32.mrf.mxu0  ;;  %v629_v45 = vpop.f32.mrf.mxu1 }
 0x13e   :  { %v2775_v46 = vadd.f32 %v556_v42, %v177_v17  ;;  %v2778_v49 = vadd.f32 %v629_v45, %v2758_v10 }
 0x13f   :  { %v558_v57 = vpop.f32.mrf.mxu0  ;;  %v631_v58 = vpop.f32.mrf.mxu1 }
 0x140   :  { %3143 = vst [vmem:[#allocation16_spill] sm:$0xff] %v2778_v49  ;;  %v2780_v59 = vadd.f32 %v558_v57, %v173_v8  ;;  %v2783_v60 = vadd.f32 %v631_v58, %v2752_v1 }
 0x141   :  { %v560_v61 = vpop.f32.mrf.mxu0  ;;  %v633_v62 = vpop.f32.mrf.mxu1 }
 0x142   :  { %3144 = vst [vmem:[#allocation17_spill] sm:$0xff] %v2780_v59  ;;  %3145 = vst [vmem:[#allocation18_spill] sm:$0xff] %v2783_v60  ;;  %v2785_v2 = vadd.f32 %v560_v61, %v177_v17  ;;  %v2788_v11 = vadd.f32 %v633_v62, %v2758_v10 }
 0x143   :  { %v564_v16 = vpop.f32.mrf.mxu0  ;;  %v637_v22 = vpop.f32.mrf.mxu1 }
 0x144   :  { %3146 = vst [vmem:[#allocation19_spill] sm:$0xff] %v2785_v2  ;;  %3147 = vst [vmem:[#allocation20_spill] sm:$0xff] %v2788_v11  ;;  %v2790_v25 = vadd.f32 %v564_v16, %v173_v8  ;;  %v2793_v32 = vadd.f32 %v637_v22, %v2752_v1 }
 0x145   :  { %v566_v35 = vpop.f32.mrf.mxu0  ;;  %v639_v42 = vpop.f32.mrf.mxu1 }
 0x146   :  { %3148 = vst [vmem:[#allocation21_spill] sm:$0xff] %v2790_v25  ;;  %3149 = vst [vmem:[#allocation22_spill] sm:$0xff] %v2793_v32  ;;  %v2795_v45 = vadd.f32 %v566_v35, %v177_v17  ;;  %v2798_v57 = vadd.f32 %v639_v42, %v2758_v10 }
 0x147   :  { %v568_v58 = vpop.f32.mrf.mxu0  ;;  %v641_v61 = vpop.f32.mrf.mxu1 }
 0x148   :  { %3150 = vst [vmem:[#allocation23_spill] sm:$0xff] %v2795_v45  ;;  %3151 = vst [vmem:[#allocation24_spill] sm:$0xff] %v2798_v57  ;;  %v2800_v56 = vadd.f32 %v568_v58, %v173_v8  ;;  %v2803_v62 = vadd.f32 %v641_v61, %v2752_v1 }
 0x149   :  { %v570_v11 = vpop.f32.mrf.mxu0  ;;  %v643_v16 = vpop.f32.mrf.mxu1 }
 0x14a   :  { %3152 = vst [vmem:[#allocation25_spill] sm:$0xff] %v2800_v56  ;;  %3153 = vst [vmem:[#allocation26_spill] sm:$0xff] %v2803_v62  ;;  %v2805_v25 = vadd.f32 %v570_v11, %v177_v17  ;;  %v2808_v22 = vadd.f32 %v643_v16, %v2758_v10 }
 0x14b   :  { %v574_v32 = vpop.f32.mrf.mxu0  ;;  %v647_v35 = vpop.f32.mrf.mxu1 }
 0x14c   :  { %3154 = vst [vmem:[#allocation27_spill] sm:$0xff] %v2805_v25  ;;  %3155 = vst [vmem:[#allocation28_spill] sm:$0xff] %v2808_v22  ;;  %v2810_v45 = vadd.f32 %v574_v32, %v173_v8  ;;  %v2813_v42 = vadd.f32 %v647_v35, %v2752_v1 }
 0x14d   :  { %v576_v57 = vpop.f32.mrf.mxu0  ;;  %v649_v58 = vpop.f32.mrf.mxu1 }
 0x14e   :  { %3156 = vst [vmem:[#allocation29_spill] sm:$0xff] %v2810_v45  ;;  %3157 = vst [vmem:[#allocation30_spill] sm:$0xff] %v2813_v42  ;;  %v2815_v56 = vadd.f32 %v576_v57, %v177_v17  ;;  %v2818_v61 = vadd.f32 %v649_v58, %v2758_v10  ;;  %v545_v45 = vadd.f32 %v2748_v63, %v173_v8 }
 0x14f   :  { %v578_v62 = vpop.f32.mrf.mxu0  ;;  %v651_v11 = vpop.f32.mrf.mxu1  ;;  %v547_v58 = vadd.f32 %v2754_v3, %v177_v17 }
 0x150   :  { %3158 = vst [vmem:[#allocation31_spill] sm:$0xff] %v2815_v56  ;;  %3159 = vst [vmem:[#allocation32_spill] sm:$0xff] %v2818_v61  ;;  %v2820_v25 = vadd.f32 %v578_v62, %v173_v8  ;;  %v2823_v16 = vadd.f32 %v651_v11, %v2752_v1  ;;  %v618_v8 = vadd.f32 %v2750_v0, %v2752_v1 }
 0x151   :  { %v580_v22 = vpop.f32.mrf.mxu0  ;;  %v653_v32 = vpop.f32.mrf.mxu1 }
 0x152   :  { %3160 = vst [vmem:[#allocation33_spill] sm:$0xff] %v2820_v25  ;;  %3161 = vst [vmem:[#allocation34_spill] sm:$0xff] %v2823_v16  ;;  %v2826_v35 = vadd.f32 %v580_v22, %v177_v17  ;;  %v2829_v42 = vadd.f32 %v653_v32, %v2758_v10  ;;  %v620_v32 = vadd.f32 %v2756_v4, %v2758_v10 }
 0x153   :  { %v921_v57 = vpop.f32.mrf.mxu0  ;;  %v962_v56 = vpop.f32.mrf.mxu1 }
 0x154   :  { %v969_v61 = vadd.f32 %v921_v57, %v545_v45  ;;  %v971_v22 = vadd.f32 %v962_v56, %v618_v8 }
 0x155   :  { %v923_v60 = vpop.f32.mrf.mxu0  ;;  %v964_v62 = vpop.f32.mrf.mxu1 }
 0x156   :  { %v2056_v25 = vmul.f32 -1.442695, %v969_v61  ;;  %v970_v2 = vadd.f32 %v923_v60, %v547_v58  ;;  %v2058_v3 = vmul.f32 -1.442695, %v971_v22  ;;  %v972_v45 = vadd.f32 %v964_v62, %v620_v32 }
 0x157   :  { %v925_v11 = vpop.f32.mrf.mxu0  ;;  %v966_v16 = vpop.f32.mrf.mxu1 }
 0x158   :  { %2282 = vpow2.f32 %v2056_v25  ;;  %v2057_v59 = vmul.f32 -1.442695, %v970_v2  ;;  %v3162_v11 = vmov 0  }
 0x159   :  { %v926_v49 = vpop.f32.mrf.mxu0  ;;  %v967_v63 = vpop.f32.mrf.mxu1 }
 0x15a   :  { %2284 = vpow2.f32 %v2057_v59 }
 0x15b   :  { %2286 = vpow2.f32 %v2058_v3 }
 0x165   :  { %v2283_v17 = vpop.eup %2282 }
 0x166   :  { %v982_v57 = vadd.f32 1.0, %v2283_v17 }
 0x167   :  { %v2285_v61 = vpop.eup %2284 }
 0x168   :  { %2288 = vrcp.f32 %v982_v57  ;;  %v983_v60 = vadd.f32 1.0, %v2285_v61  ;;  %v2287_v49 = vpop.eup %2286 }
 0x169   :  { %2290 = vtanh.f32 %v972_v45  ;;  %v984_v16 = vadd.f32 1.0, %v2287_v49 }
 0x16a   :  { %2292 = vrcp.f32 %v983_v60 }
 0x16b   :  { %2294 = vrcp.f32 %v984_v16 }
 0x175   :  { %v2289_v2 = vpop.eup %2288 }
 0x176   :  { %v2291_v59 = vpop.eup %2290 }
 0x177   :  { %v2293_v25 = vpop.eup %2292  ;;  %v993_v56 = vmul.f32 %v2291_v59, %v2289_v2 }
 0x178   :  { %v992_v0 = vmul.f32 0.0, %v2293_v25  ;;  %v2295_v4 = vpop.eup %2294 }
 0x17a   :  { %v2836_v1 = vadd.f32 %v993_v56, %v992_v0 }
 0x17c   :  { %2296 = vtanh.f32 %v2836_v1 }
 0x189   :  { %v2297_v10 = vpop.eup %2296 }
 0x18a   :  { %v996_v58 = vmul.f32 %v2297_v10, %v2295_v4 }
 0x18c   :  { %v1004_v62 = vpack.c.bf16 %v996_v58, %v996_v58 }
 0x18e   :  { %1038 = vmatmul.mubr.bf16.vlgmr.msra.gmra.mxu0 %v1004_v62  ;;  %1079 = vmatmul.mubr.bf16.vlgmr.msra.gmra.mxu1 %v1004_v62 }
 0x18f   :  { %1124 = vmatpush1.bf16.msra.mxu0 %v2613_v7  ;;  %1165 = vmatpush1.bf16.msra.mxu1 %v2615_v9 }
 0x190   :  { %1125 = vmatprep.subr.bf16.mxu0 %v2617_v12  ;;  %1166 = vmatprep.subr.bf16.mxu1 %v2621_v13 }
 0x191   :  { %1155 = vmatprep.mubr.bf16.mxu0 %v3162_v11  ;;  %1196 = vmatprep.mubr.bf16.mxu1 %v3162_v11 }
 0x193   :  { %1126 = vmatpush1.bf16.msra.mxu0 %v2623_v14  ;;  %1167 = vmatpush1.bf16.msra.mxu1 %v2625_v15 }
 0x194   :  { %1127 = vmatprep.subr.bf16.mxu0 %v2629_v19  ;;  %1168 = vmatprep.subr.bf16.mxu1 %v2631_v20 }
 0x197   :  { %1128 = vmatpush1.bf16.msra.mxu0 %v2635_v23  ;;  %1169 = vmatpush1.bf16.msra.mxu1 %v2637_v24 }
 0x198   :  { %1129 = vmatprep.subr.bf16.mxu0 %v2639_v26  ;;  %1170 = vmatprep.subr.bf16.mxu1 %v2641_v27 }
 0x19b   :  { %1130 = vmatpush1.bf16.msra.mxu0 %v2647_v29  ;;  %1171 = vmatpush1.bf16.msra.mxu1 %v2651_v30 }
 0x19c   :  { %1131 = vmatprep.subr.bf16.mxu0 %v2655_v33  ;;  %1172 = vmatprep.subr.bf16.mxu1 %v2657_v34 }
 0x19f   :  { %1132 = vmatpush1.bf16.msra.mxu0 %v2661_v38  ;;  %1173 = vmatpush1.bf16.msra.mxu1 %v2663_v39 }
 0x1a0   :  { %1133 = vmatprep.subr.bf16.mxu0 %v2667_v40  ;;  %1174 = vmatprep.subr.bf16.mxu1 %v2669_v41 }
 0x1a3   :  { %1134 = vmatpush1.bf16.msra.mxu0 %v2671_v43  ;;  %1175 = vmatpush1.bf16.msra.mxu1 %v2675_v44 }
 0x1a4   :  { %1135 = vmatprep.subr.bf16.mxu0 %v2679_v47  ;;  %1176 = vmatprep.subr.bf16.mxu1 %v2681_v48 }
 0x1a7   :  { %1136 = vmatpush1.bf16.msra.mxu0 %v2685_v50  ;;  %1177 = vmatpush1.bf16.msra.mxu1 %v2687_v51 }
 0x1a8   :  { %1137 = vmatprep.subr.bf16.mxu0 %v2691_v52  ;;  %1178 = vmatprep.subr.bf16.mxu1 %v2693_v53 }
 0x1ab   :  { %1138 = vmatpush1.bf16.msra.mxu0 %v2697_v54  ;;  %1179 = vmatpush1.bf16.msra.mxu1 %v2699_v55 }
 0x1ac   :  { %1241 = vmatprep.subr.bf16.mxu0 %v2609_v5  ;;  %1282 = vmatprep.subr.bf16.mxu1 %v2611_v6 }
 0x24e   :  { %v1039_v63 = vpop.f32.mrf.mxu0  ;;  %v1080_v8 = vpop.f32.mrf.mxu1 }
 0x24f   :  { %v1087_v22 = vadd.f32 %v1039_v63, %v2760_v18  ;;  %v1089_v59 = vadd.f32 %v1080_v8, %v2763_v21 }
 0x250   :  { %v1041_v32 = vpop.f32.mrf.mxu0  ;;  %v1082_v3 = vpop.f32.mrf.mxu1 }
 0x251   :  { %v2059_v17 = vmul.f32 -1.442695, %v1087_v22  ;;  %v1088_v45 = vadd.f32 %v1041_v32, %v2765_v28  ;;  %v2061_v25 = vmul.f32 -1.442695, %v1089_v59  ;;  %v1090_v16 = vadd.f32 %v1082_v3, %v2768_v31 }
 0x252   :  { %v1043_v57 = vpop.f32.mrf.mxu0  ;;  %v1084_v61 = vpop.f32.mrf.mxu1 }
 0x253   :  { %2298 = vpow2.f32 %v2059_v17  ;;  %v2060_v60 = vmul.f32 -1.442695, %v1088_v45 }
 0x254   :  { %v1044_v49 = vpop.f32.mrf.mxu0  ;;  %v1085_v2 = vpop.f32.mrf.mxu1 }
 0x255   :  { %2300 = vpow2.f32 %v2060_v60 }
 0x256   :  { %2302 = vpow2.f32 %v2061_v25 }
 0x257   :  { %2304 = vtanh.f32 %v1090_v16 }
 0x260   :  { %v2299_v0 = vpop.eup %2298 }
 0x261   :  { %v1100_v56 = vadd.f32 1.0, %v2299_v0 }
 0x262   :  { %v2301_v18 = vpop.eup %2300 }
 0x263   :  { %2306 = vrcp.f32 %v1100_v56  ;;  %v1101_v4 = vadd.f32 1.0, %v2301_v18  ;;  %v2303_v28 = vpop.eup %2302 }
 0x264   :  { %v2305_v10 = vpop.eup %2304  ;;  %v1102_v22 = vadd.f32 1.0, %v2303_v28  ;;  %v3163_v28 = vld [vmem:[#allocation16_spill] sm:$0xff] }
 0x265   :  { %2308 = vrcp.f32 %v1101_v4 }
 0x266   :  { %2310 = vrcp.f32 %v1102_v22 }
 0x270   :  { %v2307_v58 = vpop.eup %2306 }
 0x271   :  { %v1111_v62 = vmul.f32 %v2307_v58, %v2305_v10 }
 0x272   :  { %v2309_v63 = vpop.eup %2308 }
 0x273   :  { %v1110_v32 = vmul.f32 %v2309_v63, %v2836_v1  ;;  %v2311_v31 = vpop.eup %2310 }
 0x275   :  { %v2878_v21 = vadd.f32 %v1111_v62, %v1110_v32 }
 0x277   :  { %2312 = vtanh.f32 %v2878_v21 }
 0x284   :  { %v2313_v8 = vpop.eup %2312 }
 0x285   :  { %v1114_v3 = vmul.f32 %v2313_v8, %v2311_v31 }
 0x287   :  { %v1122_v17 = vpack.c.bf16 %v1114_v3, %v1114_v3 }
 0x289   :  { %1156 = vmatmul.mubr.bf16.vlgmr.msra.gmra.mxu0 %v1122_v17  ;;  %1197 = vmatmul.mubr.bf16.vlgmr.msra.gmra.mxu1 %v1122_v17 }
 0x28a   :  { %1242 = vmatpush1.bf16.msra.mxu0 %v2613_v7  ;;  %1283 = vmatpush1.bf16.msra.mxu1 %v2615_v9 }
 0x28b   :  { %1243 = vmatprep.subr.bf16.mxu0 %v2617_v12  ;;  %1284 = vmatprep.subr.bf16.mxu1 %v2621_v13 }
 0x28c   :  { %1273 = vmatprep.mubr.bf16.mxu0 %v3162_v11  ;;  %1314 = vmatprep.mubr.bf16.mxu1 %v3162_v11 }
 0x28e   :  { %1244 = vmatpush1.bf16.msra.mxu0 %v2623_v14  ;;  %1285 = vmatpush1.bf16.msra.mxu1 %v2625_v15 }
 0x28f   :  { %1245 = vmatprep.subr.bf16.mxu0 %v2629_v19  ;;  %1286 = vmatprep.subr.bf16.mxu1 %v2631_v20 }
 0x292   :  { %1246 = vmatpush1.bf16.msra.mxu0 %v2635_v23  ;;  %1287 = vmatpush1.bf16.msra.mxu1 %v2637_v24 }
 0x293   :  { %1247 = vmatprep.subr.bf16.mxu0 %v2639_v26  ;;  %1288 = vmatprep.subr.bf16.mxu1 %v2641_v27 }
 0x296   :  { %1248 = vmatpush1.bf16.msra.mxu0 %v2647_v29  ;;  %1289 = vmatpush1.bf16.msra.mxu1 %v2651_v30 }
 0x297   :  { %1249 = vmatprep.subr.bf16.mxu0 %v2655_v33  ;;  %1290 = vmatprep.subr.bf16.mxu1 %v2657_v34 }
 0x29a   :  { %1250 = vmatpush1.bf16.msra.mxu0 %v2661_v38  ;;  %1291 = vmatpush1.bf16.msra.mxu1 %v2663_v39 }
 0x29b   :  { %1251 = vmatprep.subr.bf16.mxu0 %v2667_v40  ;;  %1292 = vmatprep.subr.bf16.mxu1 %v2669_v41 }
 0x29e   :  { %1252 = vmatpush1.bf16.msra.mxu0 %v2671_v43  ;;  %1293 = vmatpush1.bf16.msra.mxu1 %v2675_v44 }
 0x29f   :  { %1253 = vmatprep.subr.bf16.mxu0 %v2679_v47  ;;  %1294 = vmatprep.subr.bf16.mxu1 %v2681_v48 }
 0x2a2   :  { %1254 = vmatpush1.bf16.msra.mxu0 %v2685_v50  ;;  %1295 = vmatpush1.bf16.msra.mxu1 %v2687_v51 }
 0x2a3   :  { %1255 = vmatprep.subr.bf16.mxu0 %v2691_v52  ;;  %1296 = vmatprep.subr.bf16.mxu1 %v2693_v53 }
 0x2a6   :  { %1256 = vmatpush1.bf16.msra.mxu0 %v2697_v54  ;;  %1297 = vmatpush1.bf16.msra.mxu1 %v2699_v55 }
 0x2a7   :  { %1359 = vmatprep.subr.bf16.mxu0 %v2609_v5  ;;  %1400 = vmatprep.subr.bf16.mxu1 %v2611_v6 }
 0x349   :  { %v1157_v1 = vpop.f32.mrf.mxu0  ;;  %v1198_v45 = vpop.f32.mrf.mxu1 }
 0x34a   :  { %v1205_v57 = vadd.f32 %v1157_v1, %v2770_v36  ;;  %v1207_v18 = vadd.f32 %v1198_v45, %v2773_v37 }
 0x34b   :  { %v1159_v61 = vpop.f32.mrf.mxu0  ;;  %v1200_v60 = vpop.f32.mrf.mxu1 }
 0x34c   :  { %v2062_v49 = vmul.f32 -1.442695, %v1205_v57  ;;  %v1206_v2 = vadd.f32 %v1159_v61, %v2775_v46  ;;  %v2064_v4 = vmul.f32 -1.442695, %v1207_v18  ;;  %v1208_v10 = vadd.f32 %v1200_v60, %v3163_v28 }
 0x34d   :  { %v1161_v59 = vpop.f32.mrf.mxu0  ;;  %v1202_v25 = vpop.f32.mrf.mxu1 }
 0x34e   :  { %2314 = vpow2.f32 %v2062_v49  ;;  %v2063_v16 = vmul.f32 -1.442695, %v1206_v2  ;;  %v3164_v49 = vld [vmem:[#allocation17_spill] sm:$0xff] }
 0x34f   :  { %v1162_v0 = vpop.f32.mrf.mxu0  ;;  %v1203_v56 = vpop.f32.mrf.mxu1 }
 0x350   :  { %2316 = vpow2.f32 %v2063_v16  ;;  %v3165_v0 = vld [vmem:[#allocation19_spill] sm:$0xff] }
 0x351   :  { %2318 = vpow2.f32 %v2064_v4 }
 0x352   :  { %2320 = vtanh.f32 %v1208_v10 }
 0x35b   :  { %v2315_v58 = vpop.eup %2314 }
 0x35c   :  { %v1218_v62 = vadd.f32 1.0, %v2315_v58 }
 0x35d   :  { %v2317_v36 = vpop.eup %2316 }
 0x35e   :  { %2322 = vrcp.f32 %v1218_v62  ;;  %v1219_v63 = vadd.f32 1.0, %v2317_v36  ;;  %v2319_v46 = vpop.eup %2318  ;;  %v3166_v62 = vld [vmem:[#allocation18_spill] sm:$0xff] }
 0x35f   :  { %v2321_v22 = vpop.eup %2320  ;;  %v1220_v3 = vadd.f32 1.0, %v2319_v46 }
 0x360   :  { %2324 = vrcp.f32 %v1219_v63 }
 0x361   :  { %2326 = vrcp.f32 %v1220_v3 }
 0x36b   :  { %v2323_v32 = vpop.eup %2322 }
 0x36c   :  { %v1229_v31 = vmul.f32 %v2323_v32, %v2321_v22 }
 0x36d   :  { %v2325_v8 = vpop.eup %2324 }
 0x36e   :  { %v1228_v17 = vmul.f32 %v2325_v8, %v2878_v21  ;;  %v2327_v1 = vpop.eup %2326 }
 0x370   :  { %v2920_v37 = vadd.f32 %v1229_v31, %v1228_v17 }
 0x372   :  { %2328 = vtanh.f32 %v2920_v37 }
 0x37f   :  { %v2329_v45 = vpop.eup %2328 }
 0x380   :  { %v1232_v57 = vmul.f32 %v2329_v45, %v2327_v1 }
 0x382   :  { %v1240_v61 = vpack.c.bf16 %v1232_v57, %v1232_v57 }
 0x384   :  { %1274 = vmatmul.mubr.bf16.vlgmr.msra.gmra.mxu0 %v1240_v61  ;;  %1315 = vmatmul.mubr.bf16.vlgmr.msra.gmra.mxu1 %v1240_v61 }
 0x385   :  { %1360 = vmatpush1.bf16.msra.mxu0 %v2613_v7  ;;  %1401 = vmatpush1.bf16.msra.mxu1 %v2615_v9 }
 0x386   :  { %1361 = vmatprep.subr.bf16.mxu0 %v2617_v12  ;;  %1402 = vmatprep.subr.bf16.mxu1 %v2621_v13 }
 0x387   :  { %1391 = vmatprep.mubr.bf16.mxu0 %v3162_v11  ;;  %1432 = vmatprep.mubr.bf16.mxu1 %v3162_v11 }
 0x389   :  { %1362 = vmatpush1.bf16.msra.mxu0 %v2623_v14  ;;  %1403 = vmatpush1.bf16.msra.mxu1 %v2625_v15 }
 0x38a   :  { %1363 = vmatprep.subr.bf16.mxu0 %v2629_v19  ;;  %1404 = vmatprep.subr.bf16.mxu1 %v2631_v20 }
 0x38d   :  { %1364 = vmatpush1.bf16.msra.mxu0 %v2635_v23  ;;  %1405 = vmatpush1.bf16.msra.mxu1 %v2637_v24 }
 0x38e   :  { %1365 = vmatprep.subr.bf16.mxu0 %v2639_v26  ;;  %1406 = vmatprep.subr.bf16.mxu1 %v2641_v27 }
 0x391   :  { %1366 = vmatpush1.bf16.msra.mxu0 %v2647_v29  ;;  %1407 = vmatpush1.bf16.msra.mxu1 %v2651_v30 }
 0x392   :  { %1367 = vmatprep.subr.bf16.mxu0 %v2655_v33  ;;  %1408 = vmatprep.subr.bf16.mxu1 %v2657_v34 }
 0x395   :  { %1368 = vmatpush1.bf16.msra.mxu0 %v2661_v38  ;;  %1409 = vmatpush1.bf16.msra.mxu1 %v2663_v39 }
 0x396   :  { %1369 = vmatprep.subr.bf16.mxu0 %v2667_v40  ;;  %1410 = vmatprep.subr.bf16.mxu1 %v2669_v41 }
 0x399   :  { %1370 = vmatpush1.bf16.msra.mxu0 %v2671_v43  ;;  %1411 = vmatpush1.bf16.msra.mxu1 %v2675_v44 }
 0x39a   :  { %1371 = vmatprep.subr.bf16.mxu0 %v2679_v47  ;;  %1412 = vmatprep.subr.bf16.mxu1 %v2681_v48 }
 0x39d   :  { %1372 = vmatpush1.bf16.msra.mxu0 %v2685_v50  ;;  %1413 = vmatpush1.bf16.msra.mxu1 %v2687_v51 }
 0x39e   :  { %1373 = vmatprep.subr.bf16.mxu0 %v2691_v52  ;;  %1414 = vmatprep.subr.bf16.mxu1 %v2693_v53 }
 0x3a1   :  { %1374 = vmatpush1.bf16.msra.mxu0 %v2697_v54  ;;  %1415 = vmatpush1.bf16.msra.mxu1 %v2699_v55 }
 0x3a2   :  { %1477 = vmatprep.subr.bf16.mxu0 %v2609_v5  ;;  %1518 = vmatprep.subr.bf16.mxu1 %v2611_v6  ;;  %v3167_v6 = vld [vmem:[#allocation20_spill] sm:$0xff] }
 0x444   :  { %v1275_v21 = vpop.f32.mrf.mxu0  ;;  %v1316_v60 = vpop.f32.mrf.mxu1 }
 0x445   :  { %v1323_v2 = vadd.f32 %v1275_v21, %v3164_v49  ;;  %v1325_v5 = vadd.f32 %v1316_v60, %v3166_v62 }
 0x446   :  { %v1277_v59 = vpop.f32.mrf.mxu0  ;;  %v1318_v25 = vpop.f32.mrf.mxu1 }
 0x447   :  { %v2065_v16 = vmul.f32 -1.442695, %v1323_v2  ;;  %v1324_v56 = vadd.f32 %v1277_v59, %v3165_v0  ;;  %v2067_v36 = vmul.f32 -1.442695, %v1325_v5  ;;  %v1326_v63 = vadd.f32 %v1318_v25, %v3167_v6 }
 0x448   :  { %v1279_v18 = vpop.f32.mrf.mxu0  ;;  %v1320_v4 = vpop.f32.mrf.mxu1 }
 0x449   :  { %2330 = vpow2.f32 %v2065_v16  ;;  %v2066_v28 = vmul.f32 -1.442695, %v1324_v56 }
 0x44a   :  { %v1280_v10 = vpop.f32.mrf.mxu0  ;;  %v1321_v58 = vpop.f32.mrf.mxu1 }
 0x44b   :  { %2332 = vpow2.f32 %v2066_v28 }
 0x44c   :  { %2334 = vpow2.f32 %v2067_v36 }
 0x44d   :  { %2336 = vtanh.f32 %v1326_v63 }
 0x456   :  { %v2331_v46 = vpop.eup %2330 }
 0x457   :  { %v1336_v22 = vadd.f32 1.0, %v2331_v46 }
 0x458   :  { %v2333_v32 = vpop.eup %2332 }
 0x459   :  { %2338 = vrcp.f32 %v1336_v22  ;;  %v1337_v31 = vadd.f32 1.0, %v2333_v32  ;;  %v2335_v8 = vpop.eup %2334  ;;  %v3011_v32 = vld [vmem:[#allocation8 + $0xe0] ss:$16 sps:$4 sm:$0xff]  }
 0x45a   :  { %v2337_v3 = vpop.eup %2336  ;;  %v1338_v57 = vadd.f32 1.0, %v2335_v8  ;;  %v3017_v8 = vld [vmem:[#allocation8 + $0xc4] ss:$16 sps:$4 sm:$0xff]  }
 0x45b   :  { %2340 = vrcp.f32 %v1337_v31  ;;  %v3014_v31 = vld [vmem:[#allocation8 + $0xe8] ss:$16 sps:$4 sm:$0xff]  }
 0x45c   :  { %2342 = vrcp.f32 %v1338_v57  ;;  %v3034_v57 = vld [vmem:[#allocation8 + $0xac] ss:$16 sps:$4 sm:$0xff]  }
 0x466   :  { %v2339_v17 = vpop.eup %2338 }
 0x467   :  { %v1347_v1 = vmul.f32 %v2339_v17, %v2337_v3  ;;  %v3020_v3 = vld [vmem:[#allocation8 + $0xcc] ss:$16 sps:$4 sm:$0xff]   ;;  %v3025_v17 = vld [vmem:[#allocation8 + $0xc0] ss:$16 sps:$4 sm:$0xff]  }
 0x468   :  { %v2341_v45 = vpop.eup %2340 }
 0x469   :  { %v1346_v61 = vmul.f32 %v2341_v45, %v2920_v37  ;;  %v2343_v60 = vpop.eup %2342  ;;  %v3031_v45 = vld [vmem:[#allocation8 + $0xa4] ss:$16 sps:$4 sm:$0xff]  }
 0x46b   :  { %v2962_v21 = vadd.f32 %v1347_v1, %v1346_v61  ;;  %v3028_v1 = vld [vmem:[#allocation8 + $0xc8] ss:$16 sps:$4 sm:$0xff]   ;;  %v3037_v61 = vld [vmem:[#allocation8 + $0xa0] ss:$16 sps:$4 sm:$0xff]  }
 0x46d   :  { %2344 = vtanh.f32 %v2962_v21 }
 0x47a   :  { %v2345_v49 = vpop.eup %2344 }
 0x47b   :  { %v1350_v2 = vmul.f32 %v2345_v49, %v2343_v60  ;;  %v3043_v60 = vld [vmem:[#allocation8 + $0x84] ss:$16 sps:$4 sm:$0xff]   ;;  %v3046_v49 = vld [vmem:[#allocation8 + $0x8c] ss:$16 sps:$4 sm:$0xff]  }
 0x47d   :  { %v1358_v59 = vpack.c.bf16 %v1350_v2, %v1350_v2  ;;  %v3049_v2 = vld [vmem:[#allocation8 + $0x80] ss:$16 sps:$4 sm:$0xff]  }
 0x47f   :  { %1392 = vmatmul.mubr.bf16.vlgmr.msra.gmra.mxu0 %v1358_v59  ;;  %1433 = vmatmul.mubr.bf16.vlgmr.msra.gmra.mxu1 %v1358_v59  ;;  %v3052_v59 = vld [vmem:[#allocation8 + $0x88] ss:$16 sps:$4 sm:$0xff]  }
 0x480   :  { %1478 = vmatpush1.bf16.msra.mxu0 %v2613_v7  ;;  %1519 = vmatpush1.bf16.msra.mxu1 %v2615_v9  ;;  %v2997_v7 = vld [vmem:[#allocation8 + $0xe4] ss:$16 sps:$4 sm:$0xff]   ;;  %v3000_v9 = vld [vmem:[#allocation8 + $0xec] ss:$16 sps:$4 sm:$0xff]  }
 0x481   :  { %1479 = vmatprep.subr.bf16.mxu0 %v2617_v12  ;;  %1520 = vmatprep.subr.bf16.mxu1 %v2621_v13 }
 0x482   :  { %1509 = vmatprep.mubr.bf16.mxu0 %v3162_v11  ;;  %1550 = vmatprep.mubr.bf16.mxu1 %v3162_v11 }
 0x484   :  { %1480 = vmatpush1.bf16.msra.mxu0 %v2623_v14  ;;  %1521 = vmatpush1.bf16.msra.mxu1 %v2625_v15  ;;  %v3168_v14 = vld [vmem:[#allocation21_spill] sm:$0xff] }
 0x485   :  { %1481 = vmatprep.subr.bf16.mxu0 %v2629_v19  ;;  %1522 = vmatprep.subr.bf16.mxu1 %v2631_v20 }
 0x488   :  { %1482 = vmatpush1.bf16.msra.mxu0 %v2635_v23  ;;  %1523 = vmatpush1.bf16.msra.mxu1 %v2637_v24  ;;  %v3169_v24 = vld [vmem:[#allocation23_spill] sm:$0xff] }
 0x489   :  { %1483 = vmatprep.subr.bf16.mxu0 %v2639_v26  ;;  %1524 = vmatprep.subr.bf16.mxu1 %v2641_v27 }
 0x48c   :  { %1484 = vmatpush1.bf16.msra.mxu0 %v2647_v29  ;;  %1525 = vmatpush1.bf16.msra.mxu1 %v2651_v30 }
 0x48d   :  { %1485 = vmatprep.subr.bf16.mxu0 %v2655_v33  ;;  %1526 = vmatprep.subr.bf16.mxu1 %v2657_v34 }
 0x490   :  { %1486 = vmatpush1.bf16.msra.mxu0 %v2661_v38  ;;  %1527 = vmatpush1.bf16.msra.mxu1 %v2663_v39  ;;  %v3170_v38 = vld [vmem:[#allocation22_spill] sm:$0xff] }
 0x491   :  { %1487 = vmatprep.subr.bf16.mxu0 %v2667_v40  ;;  %1528 = vmatprep.subr.bf16.mxu1 %v2669_v41  ;;  %v3171_v41 = vld [vmem:[#allocation24_spill] sm:$0xff] }
 0x494   :  { %1488 = vmatpush1.bf16.msra.mxu0 %v2671_v43  ;;  %1529 = vmatpush1.bf16.msra.mxu1 %v2675_v44 }
 0x495   :  { %1489 = vmatprep.subr.bf16.mxu0 %v2679_v47  ;;  %1530 = vmatprep.subr.bf16.mxu1 %v2681_v48 }
 0x498   :  { %1490 = vmatpush1.bf16.msra.mxu0 %v2685_v50  ;;  %1531 = vmatpush1.bf16.msra.mxu1 %v2687_v51 }
 0x499   :  { %1491 = vmatprep.subr.bf16.mxu0 %v2691_v52  ;;  %1532 = vmatprep.subr.bf16.mxu1 %v2693_v53 }
 0x49c   :  { %1492 = vmatpush1.bf16.msra.mxu0 %v2697_v54  ;;  %1533 = vmatpush1.bf16.msra.mxu1 %v2699_v55 }
 0x49d   :  { %1595 = vmatprep.subr.bf16.mxu0 %v2997_v7  ;;  %1636 = vmatprep.subr.bf16.mxu1 %v3000_v9 }
 0x53f   :  { %v1393_v12 = vpop.f32.mrf.mxu0  ;;  %v1434_v13 = vpop.f32.mrf.mxu1 }
 0x540   :  { %v1441_v15 = vadd.f32 %v1393_v12, %v3168_v14  ;;  %v1443_v39 = vadd.f32 %v1434_v13, %v3170_v38  ;;  %v3055_v12 = vld [vmem:[#allocation8 + $0x64] ss:$16 sps:$4 sm:$0xff]   ;;  %v3058_v13 = vld [vmem:[#allocation8 + $0x6c] ss:$16 sps:$4 sm:$0xff]   ;;  %v3061_v14 = vld [vmem:[#allocation8 + $0x60] ss:$16 sps:$4 sm:$0xff]  }
 0x541   :  { %v1395_v19 = vpop.f32.mrf.mxu0  ;;  %v1436_v20 = vpop.f32.mrf.mxu1 }
 0x542   :  { %v2068_v23 = vmul.f32 -1.442695, %v1441_v15  ;;  %v1442_v26 = vadd.f32 %v1395_v19, %v3169_v24  ;;  %v2070_v40 = vmul.f32 -1.442695, %v1443_v39  ;;  %v1444_v37 = vadd.f32 %v1436_v20, %v3171_v41  ;;  %v3064_v15 = vld [vmem:[#allocation8 + $0x68] ss:$16 sps:$4 sm:$0xff]  }
 0x543   :  { %v1397_v27 = vpop.f32.mrf.mxu0  ;;  %v1438_v29 = vpop.f32.mrf.mxu1  ;;  %v3067_v19 = vld [vmem:[#allocation8 + $0x44] ss:$16 sps:$4 sm:$0xff]   ;;  %v3070_v20 = vld [vmem:[#allocation8 + $0x4c] ss:$16 sps:$4 sm:$0xff]  }
 0x544   :  { %2346 = vpow2.f32 %v2068_v23  ;;  %v2069_v30 = vmul.f32 -1.442695, %v1442_v26 }
 0x545   :  { %v1398_v33 = vpop.f32.mrf.mxu0  ;;  %v1439_v34 = vpop.f32.mrf.mxu1 }
 0x546   :  { %2348 = vpow2.f32 %v2069_v30 }
 0x547   :  { %2350 = vpow2.f32 %v2070_v40 }
 0x548   :  { %2352 = vtanh.f32 %v1444_v37 }
 0x551   :  { %v2347_v25 = vpop.eup %2346 }
 0x552   :  { %v1454_v16 = vadd.f32 1.0, %v2347_v25 }
 0x553   :  { %v2349_v0 = vpop.eup %2348 }
 0x554   :  { %2354 = vrcp.f32 %v1454_v16  ;;  %v1455_v56 = vadd.f32 1.0, %v2349_v0  ;;  %v2351_v18 = vpop.eup %2350 }
 0x555   :  { %v2353_v4 = vpop.eup %2352  ;;  %v1456_v62 = vadd.f32 1.0, %v2351_v18 }
 0x556   :  { %2356 = vrcp.f32 %v1455_v56 }
 0x557   :  { %2358 = vrcp.f32 %v1456_v62 }
 0x561   :  { %v2355_v28 = vpop.eup %2354 }
 0x562   :  { %v1465_v10 = vmul.f32 %v2355_v28, %v2353_v4 }
 0x563   :  { %v2357_v58 = vpop.eup %2356 }
 0x564   :  { %v1464_v5 = vmul.f32 %v2357_v58, %v2962_v21  ;;  %v2359_v6 = vpop.eup %2358  ;;  %v3040_v21 = vld [vmem:[#allocation8 + $0xa8] ss:$16 sps:$4 sm:$0xff]  }
 0x566   :  { %v3008_v36 = vadd.f32 %v1465_v10, %v1464_v5  ;;  %v2433_v5 = vld [vmem:[#allocation8 + $0x48] ss:$16 sps:$4 sm:$0xff]  }
 0x568   :  { %2360 = vtanh.f32 %v3008_v36 }
 0x575   :  { %v2361_v63 = vpop.eup %2360 }
 0x576   :  { %v1468_v46 = vmul.f32 %v2361_v63, %v2359_v6  ;;  %v2435_v6 = vld [vmem:[#allocation8 + $0x2c] ss:$16 sps:$4 sm:$0xff]   ;;  %v2436_v63 = vld [vmem:[#allocation8 + $0x20] ss:$16 sps:$4 sm:$0xff]  }
 0x578   :  { %v1476_v22 = vpack.c.bf16 %v1468_v46, %v1468_v46  ;;  %v2437_v46 = vld [vmem:[#allocation8 + $0x28] ss:$16 sps:$4 sm:$0xff]  }
 0x57a   :  { %1510 = vmatmul.mubr.bf16.vlgmr.msra.gmra.mxu0 %v1476_v22  ;;  %1551 = vmatmul.mubr.bf16.vlgmr.msra.gmra.mxu1 %v1476_v22  ;;  %v2438_v22 = vld [vmem:[#allocation8 + $0x4] ss:$16 sps:$4 sm:$0xff]  }
 0x57b   :  { %1596 = vmatpush1.bf16.msra.mxu0 %v3011_v32  ;;  %1637 = vmatpush1.bf16.msra.mxu1 %v3014_v31 }
 0x57c   :  { %1597 = vmatprep.subr.bf16.mxu0 %v3017_v8  ;;  %1638 = vmatprep.subr.bf16.mxu1 %v3020_v3 }
 0x57d   :  { %1627 = vmatprep.mubr.bf16.mxu0 %v3162_v11  ;;  %1668 = vmatprep.mubr.bf16.mxu1 %v3162_v11 }
 0x57f   :  { %1598 = vmatpush1.bf16.msra.mxu0 %v3025_v17  ;;  %1639 = vmatpush1.bf16.msra.mxu1 %v3028_v1 }
 0x580   :  { %1599 = vmatprep.subr.bf16.mxu0 %v3031_v45  ;;  %1640 = vmatprep.subr.bf16.mxu1 %v3034_v57 }
 0x583   :  { %1600 = vmatpush1.bf16.msra.mxu0 %v3037_v61  ;;  %1641 = vmatpush1.bf16.msra.mxu1 %v3040_v21 }
 0x584   :  { %1601 = vmatprep.subr.bf16.mxu0 %v3043_v60  ;;  %1642 = vmatprep.subr.bf16.mxu1 %v3046_v49 }
 0x587   :  { %1602 = vmatpush1.bf16.msra.mxu0 %v3049_v2  ;;  %1643 = vmatpush1.bf16.msra.mxu1 %v3052_v59 }
 0x588   :  { %1603 = vmatprep.subr.bf16.mxu0 %v3055_v12  ;;  %1644 = vmatprep.subr.bf16.mxu1 %v3058_v13 }
 0x58b   :  { %1604 = vmatpush1.bf16.msra.mxu0 %v3061_v14  ;;  %1645 = vmatpush1.bf16.msra.mxu1 %v3064_v15 }
 0x58c   :  { %1605 = vmatprep.subr.bf16.mxu0 %v3067_v19  ;;  %1646 = vmatprep.subr.bf16.mxu1 %v3070_v20 }
 0x58f   :  { %1606 = vmatpush1.bf16.msra.mxu0 %v2671_v43  ;;  %1647 = vmatpush1.bf16.msra.mxu1 %v2675_v44 }
 0x590   :  { %1607 = vmatprep.subr.bf16.mxu0 %v2679_v47  ;;  %1648 = vmatprep.subr.bf16.mxu1 %v2681_v48  ;;  %v3172_v47 = vld [vmem:[#allocation25_spill] sm:$0xff] }
 0x593   :  { %1608 = vmatpush1.bf16.msra.mxu0 %v2685_v50  ;;  %1649 = vmatpush1.bf16.msra.mxu1 %v2687_v51  ;;  %v3173_v51 = vld [vmem:[#allocation27_spill] sm:$0xff] }
 0x594   :  { %1609 = vmatprep.subr.bf16.mxu0 %v2691_v52  ;;  %1650 = vmatprep.subr.bf16.mxu1 %v2693_v53 }
 0x597   :  { %1610 = vmatpush1.bf16.msra.mxu0 %v2697_v54  ;;  %1651 = vmatpush1.bf16.msra.mxu1 %v2699_v55  ;;  %v3174_v55 = vld [vmem:[#allocation26_spill] sm:$0xff] }
 0x598   :  { %1713 = vmatprep.subr.bf16.mxu0 %v2997_v7  ;;  %1754 = vmatprep.subr.bf16.mxu1 %v3000_v9  ;;  %v3175_v9 = vld [vmem:[#allocation28_spill] sm:$0xff] }
 0x63a   :  { %v1511_v43 = vpop.f32.mrf.mxu0  ;;  %v1552_v44 = vpop.f32.mrf.mxu1 }
 0x63b   :  { %v1559_v48 = vadd.f32 %v1511_v43, %v3172_v47  ;;  %v1561_v7 = vadd.f32 %v1552_v44, %v3174_v55  ;;  %v3179_v43 = vld [vmem:[#allocation32_spill] sm:$0xff] }
 0x63c   :  { %v1513_v23 = vpop.f32.mrf.mxu0  ;;  %v1554_v50 = vpop.f32.mrf.mxu1 }
 0x63d   :  { %v2071_v24 = vmul.f32 -1.442695, %v1559_v48  ;;  %v1560_v26 = vadd.f32 %v1513_v23, %v3173_v51  ;;  %v2073_v30 = vmul.f32 -1.442695, %v1561_v7  ;;  %v1562_v33 = vadd.f32 %v1554_v50, %v3175_v9 }
 0x63e   :  { %v1515_v52 = vpop.f32.mrf.mxu0  ;;  %v1556_v27 = vpop.f32.mrf.mxu1 }
 0x63f   :  { %2362 = vpow2.f32 %v2071_v24  ;;  %v2072_v53 = vmul.f32 -1.442695, %v1560_v26 }
 0x640   :  { %v1516_v54 = vpop.f32.mrf.mxu0  ;;  %v1557_v29 = vpop.f32.mrf.mxu1 }
 0x641   :  { %2364 = vpow2.f32 %v2072_v53 }
 0x642   :  { %2366 = vpow2.f32 %v2073_v30 }
 0x643   :  { %2368 = vtanh.f32 %v1562_v33  ;;  %v2274_v33 = vld [vmem:[#allocation9 + $0x38] sm:$0xff]  }
 0x64c   :  { %v2363_v34 = vpop.eup %2362 }
 0x64d   :  { %v1572_v38 = vadd.f32 1.0, %v2363_v34  ;;  %v2559_v34 = vmov 0.0  }
 0x64e   :  { %v2365_v39 = vpop.eup %2364 }
 0x64f   :  { %2370 = vrcp.f32 %v1572_v38  ;;  %v1573_v40 = vadd.f32 1.0, %v2365_v39  ;;  %v2367_v41 = vpop.eup %2366  ;;  %v2275_v38 = vld [vmem:[#allocation9 + $0x30] sm:$0xff]   ;;  %v2276_v39 = vld [vmem:[#allocation9 + $0x28] sm:$0xff]  }
 0x650   :  { %v2369_v37 = vpop.eup %2368  ;;  %v1574_v56 = vadd.f32 1.0, %v2367_v41  ;;  %v2278_v41 = vld [vmem:[#allocation9 + $0x18] sm:$0xff]  }
 0x651   :  { %2372 = vrcp.f32 %v1573_v40  ;;  %v2277_v40 = vld [vmem:[#allocation9 + $0x20] sm:$0xff]  }
 0x652   :  { %2374 = vrcp.f32 %v1574_v56 }
 0x65c   :  { %v2371_v25 = vpop.eup %2370 }
 0x65d   :  { %v1583_v16 = vmul.f32 %v2371_v25, %v2369_v37  ;;  %v2279_v37 = vld [vmem:[#allocation9 + $0x10] sm:$0xff]   ;;  %v2280_v25 = vld [vmem:[#allocation9 + $0x8] sm:$0xff]  }
 0x65e   :  { %v2373_v0 = vpop.eup %2372 }
 0x65f   :  { %v1582_v18 = vmul.f32 %v2373_v0, %v3008_v36  ;;  %v2375_v28 = vpop.eup %2374  ;;  %v2434_v36 = vld [vmem:[#allocation8 + $0x24] ss:$16 sps:$4 sm:$0xff]  }
 0x661   :  { %v3090_v4 = vadd.f32 %v1583_v16, %v1582_v18  ;;  %v2281_v16 = vld [vmem:[#allocation9] sm:$0xff]   ;;  %v3180_v18 = vld [vmem:[#allocation33_spill] sm:$0xff] }
 0x663   :  { %2376 = vtanh.f32 %v3090_v4 }
 0x670   :  { %v2377_v10 = vpop.eup %2376 }
 0x671   :  { %v1586_v58 = vmul.f32 %v2377_v10, %v2375_v28 }
 0x673   :  { %v1594_v62 = vpack.c.bf16 %v1586_v58, %v1586_v58 }
 0x675   :  { %1628 = vmatmul.mubr.bf16.vlgmr.msra.gmra.mxu0 %v1594_v62  ;;  %1669 = vmatmul.mubr.bf16.vlgmr.msra.gmra.mxu1 %v1594_v62 }
 0x676   :  { %1714 = vmatpush1.bf16.msra.mxu0 %v3011_v32  ;;  %1755 = vmatpush1.bf16.msra.mxu1 %v3014_v31  ;;  %v2439_v32 = vld [vmem:[#allocation8 + $0xc] ss:$16 sps:$4 sm:$0xff]   ;;  %v2440_v31 = vld [vmem:[#allocation8] ss:$16 sps:$4 sm:$0xff]  }
 0x677   :  { %1715 = vmatprep.subr.bf16.mxu0 %v3017_v8  ;;  %1756 = vmatprep.subr.bf16.mxu1 %v3020_v3  ;;  %v2441_v8 = vld [vmem:[#allocation8 + $0x8] ss:$16 sps:$4 sm:$0xff]  }
 0x678   :  { %1745 = vmatprep.mubr.bf16.mxu0 %v3162_v11  ;;  %1786 = vmatprep.mubr.bf16.mxu1 %v3162_v11  ;;  %v2432_v11 = vld [vmem:[#allocation8 + $0x40] ss:$16 sps:$4 sm:$0xff]  }
 0x67a   :  { %1716 = vmatpush1.bf16.msra.mxu0 %v3025_v17  ;;  %1757 = vmatpush1.bf16.msra.mxu1 %v3028_v1  ;;  %v3176_v1 = vld [vmem:[#allocation29_spill] sm:$0xff] }
 0x67b   :  { %1717 = vmatprep.subr.bf16.mxu0 %v3031_v45  ;;  %1758 = vmatprep.subr.bf16.mxu1 %v3034_v57 }
 0x67e   :  { %1718 = vmatpush1.bf16.msra.mxu0 %v3037_v61  ;;  %1759 = vmatpush1.bf16.msra.mxu1 %v3040_v21 }
 0x67f   :  { %1719 = vmatprep.subr.bf16.mxu0 %v3043_v60  ;;  %1760 = vmatprep.subr.bf16.mxu1 %v3046_v49  ;;  %v3177_v60 = vld [vmem:[#allocation31_spill] sm:$0xff] }
 0x682   :  { %1720 = vmatpush1.bf16.msra.mxu0 %v3049_v2  ;;  %1761 = vmatpush1.bf16.msra.mxu1 %v3052_v59 }
 0x683   :  { %1721 = vmatprep.subr.bf16.mxu0 %v3055_v12  ;;  %1762 = vmatprep.subr.bf16.mxu1 %v3058_v13 }
 0x686   :  { %1722 = vmatpush1.bf16.msra.mxu0 %v3061_v14  ;;  %1763 = vmatpush1.bf16.msra.mxu1 %v3064_v15  ;;  %v3178_v15 = vld [vmem:[#allocation30_spill] sm:$0xff] }
 0x687   :  { %1723 = vmatprep.subr.bf16.mxu0 %v3067_v19  ;;  %1764 = vmatprep.subr.bf16.mxu1 %v3070_v20 }
 0x68a   :  { %1724 = vmatpush1.bf16.msra.mxu0 %v2432_v11  ;;  %1765 = vmatpush1.bf16.msra.mxu1 %v2433_v5 }
 0x68b   :  { %1725 = vmatprep.subr.bf16.mxu0 %v2434_v36  ;;  %1766 = vmatprep.subr.bf16.mxu1 %v2435_v6 }
 0x68e   :  { %1726 = vmatpush1.bf16.msra.mxu0 %v2436_v63  ;;  %1767 = vmatpush1.bf16.msra.mxu1 %v2437_v46  ;;  %v3181_v46 = vld [vmem:[#allocation34_spill] sm:$0xff] }
 0x68f   :  { %1727 = vmatprep.subr.bf16.mxu0 %v2438_v22  ;;  %1768 = vmatprep.subr.bf16.mxu1 %v2439_v32 }
 0x692   :  { %1728 = vmatpush1.bf16.msra.mxu0 %v2440_v31  ;;  %1769 = vmatpush1.bf16.msra.mxu1 %v2441_v8 }
 0x693   :  { %2098 = vmatprep.subr.bf16.mxu0 %v2559_v34 }
 0x735   :  { %v1629_v3 = vpop.f32.mrf.mxu0  ;;  %v1670_v17 = vpop.f32.mrf.mxu1 }
 0x736   :  { %v1677_v45 = vadd.f32 %v1629_v3, %v3176_v1  ;;  %v1679_v19 = vadd.f32 %v1670_v17, %v3178_v15 }
 0x737   :  { %v1631_v57 = vpop.f32.mrf.mxu0  ;;  %v1672_v61 = vpop.f32.mrf.mxu1 }
 0x738   :  { %v2074_v21 = vmul.f32 -1.442695, %v1677_v45  ;;  %v1678_v49 = vadd.f32 %v1631_v57, %v3177_v60  ;;  %v2076_v20 = vmul.f32 -1.442695, %v1679_v19  ;;  %v1680_v44 = vadd.f32 %v1672_v61, %v3179_v43 }
 0x739   :  { %v1633_v2 = vpop.f32.mrf.mxu0  ;;  %v1674_v59 = vpop.f32.mrf.mxu1 }
 0x73a   :  { %2378 = vpow2.f32 %v2074_v21  ;;  %v2075_v12 = vmul.f32 -1.442695, %v1678_v49 }
 0x73b   :  { %v1634_v13 = vpop.f32.mrf.mxu0  ;;  %v1675_v14 = vpop.f32.mrf.mxu1 }
 0x73c   :  { %2380 = vpow2.f32 %v2075_v12  ;;  %v2080_v14 = vld [vmem:[%s3139_s5] ss:$0 sm:$0xff] }
 0x73d   :  { %2382 = vpow2.f32 %v2076_v20 }
 0x73e   :  { %2384 = vtanh.f32 %v1680_v44 }
 0x747   :  { %v2379_v47 = vpop.eup %2378 }
 0x748   :  { %v1690_v48 = vadd.f32 1.0, %v2379_v47 }
 0x749   :  { %v2381_v23 = vpop.eup %2380 }
 0x74a   :  { %2386 = vrcp.f32 %v1690_v48  ;;  %v1691_v50 = vadd.f32 1.0, %v2381_v23  ;;  %v2383_v24 = vpop.eup %2382 }
 0x74b   :  { %v2385_v51 = vpop.eup %2384  ;;  %v1692_v53 = vadd.f32 1.0, %v2383_v24 }
 0x74c   :  { %2388 = vrcp.f32 %v1691_v50 }
 0x74d   :  { %2390 = vrcp.f32 %v1692_v53 }
 0x757   :  { %v2387_v26 = vpop.eup %2386 }
 0x758   :  { %v1701_v52 = vmul.f32 %v2387_v26, %v2385_v51 }
 0x759   :  { %v2389_v27 = vpop.eup %2388 }
 0x75a   :  { %v1700_v54 = vmul.f32 %v2389_v27, %v3090_v4  ;;  %v2391_v55 = vpop.eup %2390 }
 0x75c   :  { %v3120_v29 = vadd.f32 %v1701_v52, %v1700_v54 }
 0x75e   :  { %2392 = vtanh.f32 %v3120_v29 }
 0x76b   :  { %v2393_v7 = vpop.eup %2392 }
 0x76c   :  { %v1704_v30 = vmul.f32 %v2393_v7, %v2391_v55 }
 0x76e   :  { %v1712_v9 = vpack.c.bf16 %v1704_v30, %v1704_v30 }
 0x770   :  { %1746 = vmatmul.mubr.bf16.vlgmr.msra.gmra.mxu0 %v1712_v9  ;;  %1787 = vmatmul.mubr.bf16.vlgmr.msra.gmra.mxu1 %v1712_v9 }
 0x771   :  { %2099 = vmatpush3.bf16.msra.mxu0 %v2274_v33  ;;  %2114 = vmatprep.mubr.msk.bf16.mxu0 %vm2560_vm0, %v2559_v34 }
 0x772   :  { %2100 = vmatprep.subr.bf16.mxu0 %v2559_v34 }
 0x775   :  { %2101 = vmatpush3.bf16.msra.mxu0 %v2275_v38 }
 0x776   :  { %2102 = vmatprep.subr.bf16.mxu0 %v2559_v34 }
 0x779   :  { %2103 = vmatpush3.bf16.msra.mxu0 %v2276_v39 }
 0x77a   :  { %2104 = vmatprep.subr.bf16.mxu0 %v2559_v34 }
 0x77d   :  { %2105 = vmatpush3.bf16.msra.mxu0 %v2277_v40 }
 0x77e   :  { %2106 = vmatprep.subr.bf16.mxu0 %v2559_v34 }
 0x781   :  { %2107 = vmatpush3.bf16.msra.mxu0 %v2278_v41 }
 0x782   :  { %2108 = vmatprep.subr.bf16.mxu0 %v2559_v34 }
 0x785   :  { %2109 = vmatpush3.bf16.msra.mxu0 %v2279_v37 }
 0x786   :  { %2110 = vmatprep.subr.bf16.mxu0 %v2559_v34 }
 0x789   :  { %2111 = vmatpush3.bf16.msra.mxu0 %v2280_v25 }
 0x78a   :  { %2112 = vmatprep.subr.bf16.mxu0 %v2559_v34 }
 0x78d   :  { %2113 = vmatpush3.bf16.msra.mxu0 %v2281_v16 }
 0x830   :  { %v1747_v0 = vpop.f32.mrf.mxu0  ;;  %v1788_v56 = vpop.f32.mrf.mxu1 }
 0x831   :  { %v1795_v4 = vadd.f32 %v1747_v0, %v3180_v18  ;;  %v1797_v22 = vadd.f32 %v1788_v56, %v3181_v46 }
 0x832   :  { %v1749_v28 = vpop.f32.mrf.mxu0  ;;  %v1790_v10 = vpop.f32.mrf.mxu1 }
 0x833   :  { %v2077_v58 = vmul.f32 -1.442695, %v1795_v4  ;;  %v1796_v62 = vadd.f32 %v1749_v28, %v2826_v35  ;;  %v2079_v32 = vmul.f32 -1.442695, %v1797_v22  ;;  %v1798_v31 = vadd.f32 %v1790_v10, %v2829_v42 }
 0x834   :  { %v1751_v11 = vpop.f32.mrf.mxu0  ;;  %v1792_v5 = vpop.f32.mrf.mxu1 }
 0x835   :  { %2394 = vpow2.f32 %v2077_v58  ;;  %v2078_v36 = vmul.f32 -1.442695, %v1796_v62 }
 0x836   :  { %v1752_v6 = vpop.f32.mrf.mxu0  ;;  %v1793_v63 = vpop.f32.mrf.mxu1 }
 0x837   :  { %2396 = vpow2.f32 %v2078_v36 }
 0x838   :  { %2398 = vpow2.f32 %v2079_v32 }
 0x839   :  { %2400 = vtanh.f32 %v1798_v31 }
 0x842   :  { %v2395_v8 = vpop.eup %2394 }
 0x843   :  { %v1808_v3 = vadd.f32 1.0, %v2395_v8 }
 0x844   :  { %v2397_v17 = vpop.eup %2396 }
 0x845   :  { %2402 = vrcp.f32 %v1808_v3  ;;  %v1809_v1 = vadd.f32 1.0, %v2397_v17  ;;  %v2399_v35 = vpop.eup %2398 }
 0x846   :  { %v2401_v45 = vpop.eup %2400  ;;  %v1810_v60 = vadd.f32 1.0, %v2399_v35 }
 0x847   :  { %2404 = vrcp.f32 %v1809_v1 }
 0x848   :  { %2406 = vrcp.f32 %v1810_v60 }
 0x852   :  { %v2403_v57 = vpop.eup %2402 }
 0x853   :  { %v1819_v61 = vmul.f32 %v2403_v57, %v2401_v45 }
 0x854   :  { %v2405_v21 = vpop.eup %2404 }
 0x855   :  { %v1818_v49 = vmul.f32 %v2405_v21, %v3120_v29  ;;  %v2407_v42 = vpop.eup %2406 }
 0x857   :  { %v1820_v2 = vadd.f32 %v1819_v61, %v1818_v49 }
 0x859   :  { %2408 = vtanh.f32 %v1820_v2 }
 0x866   :  { %v2409_v59 = vpop.eup %2408 }
 0x867   :  { %v1822_v12 = vmul.f32 %v2409_v59, %v2407_v42 }
 0x869   :  { %v1823_v13 = vpack.c.bf16 %v1822_v12, %v1822_v12 }
 0x86b   :  { %2115 = vmatmul.mubr.bf16.vlgmr.msra.gmra.mxu0 %v1823_v13 }
 0x92b   :  { %v1929_v15 = vpop.f32.mrf.mxu0 }
 0x92c   :  { %v1930_v19 = vadd.f32 %v2080_v14, %v1929_v15 }
 0x92d   :  { %v2116_v20 = vpop.f32.mrf.mxu0 }
 0x92e   :  { %1935 = vst [vmem:[#allocation11] sm:$0xff] %v1930_v19 }
 0x92f   :  { %v1932_v43 = vpop.f32.mrf.mxu0 }
 0x930   :  { %2533 = shalt.err (!%p2530_p10)
}
 0x931   :  { %1945 = dma.vmem_to_hbm [thread:$0]  %s1943_s21, 128, %s3140_s6, [#allocation5]   ;;  %v2117_v44 = vpop.f32.mrf.mxu0 }
 0x932   :  { %2548 = dma.done.wait [#allocation5], 128  }
 0x933   :  { %2549 = vsyncadd [#allocation5], 4294967168 }
 0x934   :  { %1949 = vsyncpa [#allocation4], 1 }
 0x935   :  { %1950 = vsyncpa [#allocation7], 1 }
 0x936   :  { %1951 = vsyncpa [#allocation10], 1 }
 0x937   :  { %1952 = vsyncpa [#allocation5], 1 }

</bundles_post_ra>
